<compile_context>
chip_gen: v5e
topology: v5e:2x2
jax: 0.10.0
libtpu: 0.0.40
codegen_flags: <defaults>
</compile_context>

<pallas_src>
import functools

import jax
import jax.numpy as jnp
from jax.experimental import pallas as pl
from jax.experimental.pallas import tpu as pltpu  # noqa: F401  (kept for TPU-specific tuning hooks)


# ------------------------------ Pallas kernel -------------------------------

def _stable_softplus(v):
    # == log1p(exp(v)) but overflow-safe; the log argument is always in [1, 2].
    return jnp.maximum(v, 0.0) + jnp.log(1.0 + jnp.exp(-jnp.abs(v)))


def _var_linear(h, wmu, wrho, bmu, brho, eps, *, apply_relu):
    """One VariationalLinear layer on in-VMEM values.

    h    : (B, K)   activations
    wmu  : (N, K)   mean weights (PyTorch layout, bias column split off)
    wrho : (N, K)   rho weights
    bmu  : (1, N)   bias means
    brho : (1, N)   bias rhos
    eps  : (B, N)   reparameterization noise
    """
    dn = (((1,), (1,)), ((), ()))  # contract K on both sides: h @ W^T, no transpose op
    mean = jax.lax.dot_general(h, wmu, dn,
                               preferred_element_type=jnp.float32) + bmu
    sig_w = _stable_softplus(wrho)
    sig_b = _stable_softplus(brho)
    var = (jax.lax.dot_general(h * h, sig_w * sig_w, dn,
                               preferred_element_type=jnp.float32)
           + sig_b * sig_b + 1e-16)
    y = mean + jnp.sqrt(var) * eps
    if apply_relu:
        y = jnp.maximum(y, 0.0)
    return y


def _vcl_fused_kernel(*refs, n_layers):
    """Fused forward: n_layers = (#hidden layers) + 1 (the task head, no ReLU).

    refs layout: x, eps_1..eps_n, [w_mu, w_rho, b_mu, b_rho] * n_layers, out
    """
    x_ref = refs[0]
    eps_refs = refs[1:1 + n_layers]
    w_refs = refs[1 + n_layers:1 + 5 * n_layers]
    o_ref = refs[-1]

    h = x_ref[...]
    for li in range(n_layers):                 # unrolled at trace time
        wmu, wrho, bmu, brho = w_refs[4 * li:4 * li + 4]
        h = _var_linear(h, wmu[...], wrho[...], bmu[...], brho[...],
                        eps_refs[li][...],
                        apply_relu=(li < n_layers - 1))
    o_ref[...] = h.astype(o_ref.dtype)


def _full_spec(shape):
    # whole array as a single resident VMEM block
    return pl.BlockSpec(shape, lambda i: (0,) * len(shape))


def _fused_forward(x_pad, eps_list, layer_param_list):
    """Single pallas_call running the entire network."""
    n_layers = len(layer_param_list)
    operands = [x_pad] + list(eps_list)
    for p in layer_param_list:
        operands += [p["w_mu"], p["w_rho"], p["b_mu"], p["b_rho"]]

    b_pad = x_pad.shape[0]
    out_feats = layer_param_list[-1]["w_mu"].shape[0]
    kernel = functools.partial(_vcl_fused_kernel, n_layers=n_layers)

    return pl.pallas_call(
        kernel,
        out_shape=jax.ShapeDtypeStruct((b_pad, out_feats), jnp.float32),
        grid=(1,),
        in_specs=[_full_spec(op.shape) for op in operands],
        out_specs=_full_spec((b_pad, out_feats)),
    )(*operands)


# --------------------------- Model construction -----------------------------

def init_varlinear_params(key, in_feats, out_feats):
    """Matches variable_normal((out, in+1), std=0.1) / variable_fill(-3.0),
    with the bias column of the PyTorch (out, in+1) weight stored separately
    in the kernel-friendly layout (done ONCE at init, never per forward)."""
    kw, kb = jax.random.split(key)
    return {
        "w_mu": 0.1 * jax.random.normal(kw, (out_feats, in_feats), jnp.float32),
        "b_mu": 0.1 * jax.random.normal(kb, (1, out_feats), jnp.float32),
        "w_rho": jnp.full((out_feats, in_feats), -3.0, jnp.float32),
        "b_rho": jnp.full((1, out_feats), -3.0, jnp.float32),
    }


def init_vcl_multihead(key, input_size, hidden_sizes, output_size, n_tasks):
    params = {"layers": [], "heads": []}
    sizes = (input_size,) + tuple(hidden_sizes)
    for i in range(len(hidden_sizes)):
        key, sub = jax.random.split(key)
        params["layers"].append(init_varlinear_params(sub, sizes[i], sizes[i + 1]))
    for _ in range(n_tasks):
        key, sub = jax.random.split(key)
        params["heads"].append(
            init_varlinear_params(sub, hidden_sizes[-1], output_size))
    return params


@functools.partial(jax.jit, static_argnums=(3,))
def vcl_multihead_forward(params, x, eps_key, task_id):
    """Forward pass of VCLMultiHeadNN (training-mode reparameterization)."""
    B = x.shape[0]
    h = x.reshape(B, -1).astype(jnp.float32)          # nn.Flatten()

    # Sublane-align the batch (pad rows are discarded after the kernel).
    b_pad = ((B + 7) // 8) * 8
    if b_pad != B:
        h = jnp.pad(h, ((0, b_pad - B), (0, 0)))

    # Static head selection == ModuleList[task_id]; only this head is DMA'd.
    chain = list(params["layers"]) + [params["heads"][task_id]]

    # eps ~ N(0,1) per layer, shape (B, out) like the PyTorch reference.
    # TODO(synk): could move eps generation in-kernel (pltpu.prng_random_bits +
    # Box-Muller) to drop these tiny RNG ops; kept external for exact N(0,1).
    keys = jax.random.split(eps_key, len(chain))
    eps_list = [jax.random.normal(k, (b_pad, p["w_mu"].shape[0]), jnp.float32)
                for k, p in zip(keys, chain)]

    out = _fused_forward(h, eps_list, chain)
    return out[:B]


# ----------------------------------- Main ------------------------------------

if __name__ == "__main__":
    key = jax.random.PRNGKey(0)
    key, pkey, xkey, ekey = jax.random.split(key, 4)

    # Small, module-consistent shapes: x is NCHW -> flattened input_size.
    B, C, H, W = 2, 4, 16, 16
    input_size = C * H * W          # 1024
    hidden_sizes = (64, 32)
    output_size = 10
    n_tasks = 3
    task_id = 1

    params = init_vcl_multihead(pkey, input_size, hidden_sizes,
                                output_size, n_tasks)
    x = jax.random.normal(xkey, (B, C, H, W), dtype=jnp.float32)

    out = vcl_multihead_forward(params, x, ekey, task_id)
    out = jax.block_until_ready(out)

    assert out.shape == (B, output_size), out.shape
    assert out.dtype == jnp.float32
    assert bool(jnp.all(jnp.isfinite(out)))
    print("KERNEL_OK")
</pallas_src>

<mosaic_0001>
module attributes {stable_mosaic.version = 11 : i64} {
  func.func @_vcl_fused_kernel(%arg0: i32, %arg1: memref<8x1024xf32, #tpu.memory_space<vmem>>, %arg2: memref<8x64xf32, #tpu.memory_space<vmem>>, %arg3: memref<8x32xf32, #tpu.memory_space<vmem>>, %arg4: memref<8x10xf32, #tpu.memory_space<vmem>>, %arg5: memref<64x1024xf32, #tpu.memory_space<vmem>>, %arg6: memref<64x1024xf32, #tpu.memory_space<vmem>>, %arg7: memref<1x64xf32, #tpu.memory_space<vmem>>, %arg8: memref<1x64xf32, #tpu.memory_space<vmem>>, %arg9: memref<32x64xf32, #tpu.memory_space<vmem>>, %arg10: memref<32x64xf32, #tpu.memory_space<vmem>>, %arg11: memref<1x32xf32, #tpu.memory_space<vmem>>, %arg12: memref<1x32xf32, #tpu.memory_space<vmem>>, %arg13: memref<10x32xf32, #tpu.memory_space<vmem>>, %arg14: memref<10x32xf32, #tpu.memory_space<vmem>>, %arg15: memref<1x10xf32, #tpu.memory_space<vmem>>, %arg16: memref<1x10xf32, #tpu.memory_space<vmem>>, %arg17: memref<8x10xf32, #tpu.memory_space<vmem>>) attributes {dimension_semantics = [#tpu.dimension_semantics<arbitrary>], iteration_bounds = array<i64: 1>, scalar_prefetch = 0 : i64, scratch_operands = 0 : i64, tpu.core_type = #tpu.core_type<tc>, window_params = [{pipeline_mode = #tpu.pipeline_mode<synchronous>, transform_indices = @transform_0, window_bounds = array<i64: 8, 1024>}, {pipeline_mode = #tpu.pipeline_mode<synchronous>, transform_indices = @transform_1, window_bounds = array<i64: 8, 64>}, {pipeline_mode = #tpu.pipeline_mode<synchronous>, transform_indices = @transform_2, window_bounds = array<i64: 8, 32>}, {pipeline_mode = #tpu.pipeline_mode<synchronous>, transform_indices = @transform_3, window_bounds = array<i64: 8, 10>}, {pipeline_mode = #tpu.pipeline_mode<synchronous>, transform_indices = @transform_4, window_bounds = array<i64: 64, 1024>}, {pipeline_mode = #tpu.pipeline_mode<synchronous>, transform_indices = @transform_5, window_bounds = array<i64: 64, 1024>}, {pipeline_mode = #tpu.pipeline_mode<synchronous>, transform_indices = @transform_6, window_bounds = array<i64: 1, 64>}, {pipeline_mode = #tpu.pipeline_mode<synchronous>, transform_indices = @transform_7, window_bounds = array<i64: 1, 64>}, {pipeline_mode = #tpu.pipeline_mode<synchronous>, transform_indices = @transform_8, window_bounds = array<i64: 32, 64>}, {pipeline_mode = #tpu.pipeline_mode<synchronous>, transform_indices = @transform_9, window_bounds = array<i64: 32, 64>}, {pipeline_mode = #tpu.pipeline_mode<synchronous>, transform_indices = @transform_10, window_bounds = array<i64: 1, 32>}, {pipeline_mode = #tpu.pipeline_mode<synchronous>, transform_indices = @transform_11, window_bounds = array<i64: 1, 32>}, {pipeline_mode = #tpu.pipeline_mode<synchronous>, transform_indices = @transform_12, window_bounds = array<i64: 10, 32>}, {pipeline_mode = #tpu.pipeline_mode<synchronous>, transform_indices = @transform_13, window_bounds = array<i64: 10, 32>}, {pipeline_mode = #tpu.pipeline_mode<synchronous>, transform_indices = @transform_14, window_bounds = array<i64: 1, 10>}, {pipeline_mode = #tpu.pipeline_mode<synchronous>, transform_indices = @transform_15, window_bounds = array<i64: 1, 10>}, {pipeline_mode = #tpu.pipeline_mode<synchronous>, transform_indices = @transform_16, window_bounds = array<i64: 8, 10>}]} {
    %c0 = arith.constant 0 : index
    %c0_0 = arith.constant 0 : index
    %0 = vector.load %arg1[%c0, %c0_0] : memref<8x1024xf32, #tpu.memory_space<vmem>>, vector<8x1024xf32>
    %c0_1 = arith.constant 0 : index
    %c0_2 = arith.constant 0 : index
    %1 = vector.load %arg5[%c0_1, %c0_2] : memref<64x1024xf32, #tpu.memory_space<vmem>>, vector<64x1024xf32>
    %c0_3 = arith.constant 0 : index
    %c0_4 = arith.constant 0 : index
    %2 = vector.load %arg6[%c0_3, %c0_4] : memref<64x1024xf32, #tpu.memory_space<vmem>>, vector<64x1024xf32>
    %c0_5 = arith.constant 0 : index
    %c0_6 = arith.constant 0 : index
    %3 = vector.load %arg7[%c0_5, %c0_6] : memref<1x64xf32, #tpu.memory_space<vmem>>, vector<1x64xf32>
    %c0_7 = arith.constant 0 : index
    %c0_8 = arith.constant 0 : index
    %4 = vector.load %arg8[%c0_7, %c0_8] : memref<1x64xf32, #tpu.memory_space<vmem>>, vector<1x64xf32>
    %c0_9 = arith.constant 0 : index
    %c0_10 = arith.constant 0 : index
    %5 = vector.load %arg2[%c0_9, %c0_10] : memref<8x64xf32, #tpu.memory_space<vmem>>, vector<8x64xf32>
    %cst = arith.constant dense<0.000000e+00> : vector<8x64xf32>
    %6 = tpu.matmul %0, %1, %cst {dimension_numbers = #tpu.dot_dimension_numbers<[1], [1], [0], [0], [0, 0, 1, 0], [], []>} : vector<8x1024xf32>, vector<64x1024xf32>, vector<8x64xf32> -> vector<8x64xf32>
    %7 = vector.broadcast %3 : vector<1x64xf32> to vector<8x64xf32>
    %8 = arith.addf %6, %7 : vector<8x64xf32>
    %cst_11 = arith.constant 0.000000e+00 : f32
    %9 = vector.broadcast %cst_11 : f32 to vector<64x1024xf32>
    %10 = arith.maximumf %2, %9 : vector<64x1024xf32>
    %11 = math.absf %2 : vector<64x1024xf32>
    %cst_12 = arith.constant 0.000000e+00 : f32
    %12 = vector.broadcast %cst_12 : f32 to vector<64x1024xf32>
    %13 = arith.subf %12, %11 : vector<64x1024xf32>
    %14 = math.exp %13 : vector<64x1024xf32>
    %cst_13 = arith.constant 1.000000e+00 : f32
    %15 = vector.broadcast %cst_13 : f32 to vector<64x1024xf32>
    %16 = arith.addf %15, %14 : vector<64x1024xf32>
    %17 = math.log %16 : vector<64x1024xf32>
    %18 = arith.addf %10, %17 : vector<64x1024xf32>
    %cst_14 = arith.constant 0.000000e+00 : f32
    %19 = vector.broadcast %cst_14 : f32 to vector<1x64xf32>
    %20 = arith.maximumf %4, %19 : vector<1x64xf32>
    %21 = math.absf %4 : vector<1x64xf32>
    %cst_15 = arith.constant 0.000000e+00 : f32
    %22 = vector.broadcast %cst_15 : f32 to vector<1x64xf32>
    %23 = arith.subf %22, %21 : vector<1x64xf32>
    %24 = math.exp %23 : vector<1x64xf32>
    %cst_16 = arith.constant 1.000000e+00 : f32
    %25 = vector.broadcast %cst_16 : f32 to vector<1x64xf32>
    %26 = arith.addf %25, %24 : vector<1x64xf32>
    %27 = math.log %26 : vector<1x64xf32>
    %28 = arith.addf %20, %27 : vector<1x64xf32>
    %29 = arith.mulf %0, %0 : vector<8x1024xf32>
    %30 = arith.mulf %18, %18 : vector<64x1024xf32>
    %cst_17 = arith.constant dense<0.000000e+00> : vector<8x64xf32>
    %31 = tpu.matmul %29, %30, %cst_17 {dimension_numbers = #tpu.dot_dimension_numbers<[1], [1], [0], [0], [0, 0, 1, 0], [], []>} : vector<8x1024xf32>, vector<64x1024xf32>, vector<8x64xf32> -> vector<8x64xf32>
    %32 = arith.mulf %28, %28 : vector<1x64xf32>
    %33 = vector.broadcast %32 : vector<1x64xf32> to vector<8x64xf32>
    %34 = arith.addf %31, %33 : vector<8x64xf32>
    %cst_18 = arith.constant 1.000000e-16 : f32
    %35 = vector.broadcast %cst_18 : f32 to vector<8x64xf32>
    %36 = arith.addf %34, %35 : vector<8x64xf32>
    %37 = math.sqrt %36 : vector<8x64xf32>
    %38 = arith.mulf %37, %5 : vector<8x64xf32>
    %39 = arith.addf %8, %38 : vector<8x64xf32>
    %cst_19 = arith.constant 0.000000e+00 : f32
    %40 = vector.broadcast %cst_19 : f32 to vector<8x64xf32>
    %41 = arith.maximumf %39, %40 : vector<8x64xf32>
    %c0_20 = arith.constant 0 : index
    %c0_21 = arith.constant 0 : index
    %42 = vector.load %arg9[%c0_20, %c0_21] : memref<32x64xf32, #tpu.memory_space<vmem>>, vector<32x64xf32>
    %c0_22 = arith.constant 0 : index
    %c0_23 = arith.constant 0 : index
    %43 = vector.load %arg10[%c0_22, %c0_23] : memref<32x64xf32, #tpu.memory_space<vmem>>, vector<32x64xf32>
    %c0_24 = arith.constant 0 : index
    %c0_25 = arith.constant 0 : index
    %44 = vector.load %arg11[%c0_24, %c0_25] : memref<1x32xf32, #tpu.memory_space<vmem>>, vector<1x32xf32>
    %c0_26 = arith.constant 0 : index
    %c0_27 = arith.constant 0 : index
    %45 = vector.load %arg12[%c0_26, %c0_27] : memref<1x32xf32, #tpu.memory_space<vmem>>, vector<1x32xf32>
    %c0_28 = arith.constant 0 : index
    %c0_29 = arith.constant 0 : index
    %46 = vector.load %arg3[%c0_28, %c0_29] : memref<8x32xf32, #tpu.memory_space<vmem>>, vector<8x32xf32>
    %cst_30 = arith.constant dense<0.000000e+00> : vector<8x32xf32>
    %47 = tpu.matmul %41, %42, %cst_30 {dimension_numbers = #tpu.dot_dimension_numbers<[1], [1], [0], [0], [0, 0, 1, 0], [], []>} : vector<8x64xf32>, vector<32x64xf32>, vector<8x32xf32> -> vector<8x32xf32>
    %48 = vector.broadcast %44 : vector<1x32xf32> to vector<8x32xf32>
    %49 = arith.addf %47, %48 : vector<8x32xf32>
    %cst_31 = arith.constant 0.000000e+00 : f32
    %50 = vector.broadcast %cst_31 : f32 to vector<32x64xf32>
    %51 = arith.maximumf %43, %50 : vector<32x64xf32>
    %52 = math.absf %43 : vector<32x64xf32>
    %cst_32 = arith.constant 0.000000e+00 : f32
    %53 = vector.broadcast %cst_32 : f32 to vector<32x64xf32>
    %54 = arith.subf %53, %52 : vector<32x64xf32>
    %55 = math.exp %54 : vector<32x64xf32>
    %cst_33 = arith.constant 1.000000e+00 : f32
    %56 = vector.broadcast %cst_33 : f32 to vector<32x64xf32>
    %57 = arith.addf %56, %55 : vector<32x64xf32>
    %58 = math.log %57 : vector<32x64xf32>
    %59 = arith.addf %51, %58 : vector<32x64xf32>
    %cst_34 = arith.constant 0.000000e+00 : f32
    %60 = vector.broadcast %cst_34 : f32 to vector<1x32xf32>
    %61 = arith.maximumf %45, %60 : vector<1x32xf32>
    %62 = math.absf %45 : vector<1x32xf32>
    %cst_35 = arith.constant 0.000000e+00 : f32
    %63 = vector.broadcast %cst_35 : f32 to vector<1x32xf32>
    %64 = arith.subf %63, %62 : vector<1x32xf32>
    %65 = math.exp %64 : vector<1x32xf32>
    %cst_36 = arith.constant 1.000000e+00 : f32
    %66 = vector.broadcast %cst_36 : f32 to vector<1x32xf32>
    %67 = arith.addf %66, %65 : vector<1x32xf32>
    %68 = math.log %67 : vector<1x32xf32>
    %69 = arith.addf %61, %68 : vector<1x32xf32>
    %70 = arith.mulf %41, %41 : vector<8x64xf32>
    %71 = arith.mulf %59, %59 : vector<32x64xf32>
    %cst_37 = arith.constant dense<0.000000e+00> : vector<8x32xf32>
    %72 = tpu.matmul %70, %71, %cst_37 {dimension_numbers = #tpu.dot_dimension_numbers<[1], [1], [0], [0], [0, 0, 1, 0], [], []>} : vector<8x64xf32>, vector<32x64xf32>, vector<8x32xf32> -> vector<8x32xf32>
    %73 = arith.mulf %69, %69 : vector<1x32xf32>
    %74 = vector.broadcast %73 : vector<1x32xf32> to vector<8x32xf32>
    %75 = arith.addf %72, %74 : vector<8x32xf32>
    %cst_38 = arith.constant 1.000000e-16 : f32
    %76 = vector.broadcast %cst_38 : f32 to vector<8x32xf32>
    %77 = arith.addf %75, %76 : vector<8x32xf32>
    %78 = math.sqrt %77 : vector<8x32xf32>
    %79 = arith.mulf %78, %46 : vector<8x32xf32>
    %80 = arith.addf %49, %79 : vector<8x32xf32>
    %cst_39 = arith.constant 0.000000e+00 : f32
    %81 = vector.broadcast %cst_39 : f32 to vector<8x32xf32>
    %82 = arith.maximumf %80, %81 : vector<8x32xf32>
    %c0_40 = arith.constant 0 : index
    %c0_41 = arith.constant 0 : index
    %83 = vector.load %arg13[%c0_40, %c0_41] : memref<10x32xf32, #tpu.memory_space<vmem>>, vector<10x32xf32>
    %c0_42 = arith.constant 0 : index
    %c0_43 = arith.constant 0 : index
    %84 = vector.load %arg14[%c0_42, %c0_43] : memref<10x32xf32, #tpu.memory_space<vmem>>, vector<10x32xf32>
    %c0_44 = arith.constant 0 : index
    %c0_45 = arith.constant 0 : index
    %85 = vector.load %arg15[%c0_44, %c0_45] : memref<1x10xf32, #tpu.memory_space<vmem>>, vector<1x10xf32>
    %c0_46 = arith.constant 0 : index
    %c0_47 = arith.constant 0 : index
    %86 = vector.load %arg16[%c0_46, %c0_47] : memref<1x10xf32, #tpu.memory_space<vmem>>, vector<1x10xf32>
    %c0_48 = arith.constant 0 : index
    %c0_49 = arith.constant 0 : index
    %87 = vector.load %arg4[%c0_48, %c0_49] : memref<8x10xf32, #tpu.memory_space<vmem>>, vector<8x10xf32>
    %cst_50 = arith.constant dense<0.000000e+00> : vector<8x10xf32>
    %88 = tpu.matmul %82, %83, %cst_50 {dimension_numbers = #tpu.dot_dimension_numbers<[1], [1], [0], [0], [0, 0, 1, 0], [], []>} : vector<8x32xf32>, vector<10x32xf32>, vector<8x10xf32> -> vector<8x10xf32>
    %89 = vector.broadcast %85 : vector<1x10xf32> to vector<8x10xf32>
    %90 = arith.addf %88, %89 : vector<8x10xf32>
    %cst_51 = arith.constant 0.000000e+00 : f32
    %91 = vector.broadcast %cst_51 : f32 to vector<10x32xf32>
    %92 = arith.maximumf %84, %91 : vector<10x32xf32>
    %93 = math.absf %84 : vector<10x32xf32>
    %cst_52 = arith.constant 0.000000e+00 : f32
    %94 = vector.broadcast %cst_52 : f32 to vector<10x32xf32>
    %95 = arith.subf %94, %93 : vector<10x32xf32>
    %96 = math.exp %95 : vector<10x32xf32>
    %cst_53 = arith.constant 1.000000e+00 : f32
    %97 = vector.broadcast %cst_53 : f32 to vector<10x32xf32>
    %98 = arith.addf %97, %96 : vector<10x32xf32>
    %99 = math.log %98 : vector<10x32xf32>
    %100 = arith.addf %92, %99 : vector<10x32xf32>
    %cst_54 = arith.constant 0.000000e+00 : f32
    %101 = vector.broadcast %cst_54 : f32 to vector<1x10xf32>
    %102 = arith.maximumf %86, %101 : vector<1x10xf32>
    %103 = math.absf %86 : vector<1x10xf32>
    %cst_55 = arith.constant 0.000000e+00 : f32
    %104 = vector.broadcast %cst_55 : f32 to vector<1x10xf32>
    %105 = arith.subf %104, %103 : vector<1x10xf32>
    %106 = math.exp %105 : vector<1x10xf32>
    %cst_56 = arith.constant 1.000000e+00 : f32
    %107 = vector.broadcast %cst_56 : f32 to vector<1x10xf32>
    %108 = arith.addf %107, %106 : vector<1x10xf32>
    %109 = math.log %108 : vector<1x10xf32>
    %110 = arith.addf %102, %109 : vector<1x10xf32>
    %111 = arith.mulf %82, %82 : vector<8x32xf32>
    %112 = arith.mulf %100, %100 : vector<10x32xf32>
    %cst_57 = arith.constant dense<0.000000e+00> : vector<8x10xf32>
    %113 = tpu.matmul %111, %112, %cst_57 {dimension_numbers = #tpu.dot_dimension_numbers<[1], [1], [0], [0], [0, 0, 1, 0], [], []>} : vector<8x32xf32>, vector<10x32xf32>, vector<8x10xf32> -> vector<8x10xf32>
    %114 = arith.mulf %110, %110 : vector<1x10xf32>
    %115 = vector.broadcast %114 : vector<1x10xf32> to vector<8x10xf32>
    %116 = arith.addf %113, %115 : vector<8x10xf32>
    %cst_58 = arith.constant 1.000000e-16 : f32
    %117 = vector.broadcast %cst_58 : f32 to vector<8x10xf32>
    %118 = arith.addf %116, %117 : vector<8x10xf32>
    %119 = math.sqrt %118 : vector<8x10xf32>
    %120 = arith.mulf %119, %87 : vector<8x10xf32>
    %121 = arith.addf %90, %120 : vector<8x10xf32>
    %c0_59 = arith.constant 0 : index
    %c0_60 = arith.constant 0 : index
    %122 = vector.load %arg17[%c0_59, %c0_60] : memref<8x10xf32, #tpu.memory_space<vmem>>, vector<8x10xf32>
    tpu.vector_store %arg17[%c0_59, %c0_60], %121 {strides = array<i32>} : memref<8x10xf32, #tpu.memory_space<vmem>>, vector<8x10xf32>,
    return
  }
  func.func @transform_0(%arg0: i32) -> (i32, i32) {
    %c0_i32 = arith.constant 0 : i32
    %c0_i32_0 = arith.constant 0 : i32
    %c0_i32_1 = arith.constant 0 : i32
    return %c0_i32, %c0_i32_0 : i32, i32
  }
  func.func @transform_1(%arg0: i32) -> (i32, i32) {
    %c0_i32 = arith.constant 0 : i32
    %c0_i32_0 = arith.constant 0 : i32
    %c0_i32_1 = arith.constant 0 : i32
    return %c0_i32, %c0_i32_0 : i32, i32
  }
  func.func @transform_2(%arg0: i32) -> (i32, i32) {
    %c0_i32 = arith.constant 0 : i32
    %c0_i32_0 = arith.constant 0 : i32
    %c0_i32_1 = arith.constant 0 : i32
    return %c0_i32, %c0_i32_0 : i32, i32
  }
  func.func @transform_3(%arg0: i32) -> (i32, i32) {
    %c0_i32 = arith.constant 0 : i32
    %c0_i32_0 = arith.constant 0 : i32
    %c0_i32_1 = arith.constant 0 : i32
    return %c0_i32, %c0_i32_0 : i32, i32
  }
  func.func @transform_4(%arg0: i32) -> (i32, i32) {
    %c0_i32 = arith.constant 0 : i32
    %c0_i32_0 = arith.constant 0 : i32
    %c0_i32_1 = arith.constant 0 : i32
    return %c0_i32, %c0_i32_0 : i32, i32
  }
  func.func @transform_5(%arg0: i32) -> (i32, i32) {
    %c0_i32 = arith.constant 0 : i32
    %c0_i32_0 = arith.constant 0 : i32
    %c0_i32_1 = arith.constant 0 : i32
    return %c0_i32, %c0_i32_0 : i32, i32
  }
  func.func @transform_6(%arg0: i32) -> (i32, i32) {
    %c0_i32 = arith.constant 0 : i32
    %c0_i32_0 = arith.constant 0 : i32
    %c0_i32_1 = arith.constant 0 : i32
    return %c0_i32, %c0_i32_0 : i32, i32
  }
  func.func @transform_7(%arg0: i32) -> (i32, i32) {
    %c0_i32 = arith.constant 0 : i32
    %c0_i32_0 = arith.constant 0 : i32
    %c0_i32_1 = arith.constant 0 : i32
    return %c0_i32, %c0_i32_0 : i32, i32
  }
  func.func @transform_8(%arg0: i32) -> (i32, i32) {
    %c0_i32 = arith.constant 0 : i32
    %c0_i32_0 = arith.constant 0 : i32
    %c0_i32_1 = arith.constant 0 : i32
    return %c0_i32, %c0_i32_0 : i32, i32
  }
  func.func @transform_9(%arg0: i32) -> (i32, i32) {
    %c0_i32 = arith.constant 0 : i32
    %c0_i32_0 = arith.constant 0 : i32
    %c0_i32_1 = arith.constant 0 : i32
    return %c0_i32, %c0_i32_0 : i32, i32
  }
  func.func @transform_10(%arg0: i32) -> (i32, i32) {
    %c0_i32 = arith.constant 0 : i32
    %c0_i32_0 = arith.constant 0 : i32
    %c0_i32_1 = arith.constant 0 : i32
    return %c0_i32, %c0_i32_0 : i32, i32
  }
  func.func @transform_11(%arg0: i32) -> (i32, i32) {
    %c0_i32 = arith.constant 0 : i32
    %c0_i32_0 = arith.constant 0 : i32
    %c0_i32_1 = arith.constant 0 : i32
    return %c0_i32, %c0_i32_0 : i32, i32
  }
  func.func @transform_12(%arg0: i32) -> (i32, i32) {
    %c0_i32 = arith.constant 0 : i32
    %c0_i32_0 = arith.constant 0 : i32
    %c0_i32_1 = arith.constant 0 : i32
    return %c0_i32, %c0_i32_0 : i32, i32
  }
  func.func @transform_13(%arg0: i32) -> (i32, i32) {
    %c0_i32 = arith.constant 0 : i32
    %c0_i32_0 = arith.constant 0 : i32
    %c0_i32_1 = arith.constant 0 : i32
    return %c0_i32, %c0_i32_0 : i32, i32
  }
  func.func @transform_14(%arg0: i32) -> (i32, i32) {
    %c0_i32 = arith.constant 0 : i32
    %c0_i32_0 = arith.constant 0 : i32
    %c0_i32_1 = arith.constant 0 : i32
    return %c0_i32, %c0_i32_0 : i32, i32
  }
  func.func @transform_15(%arg0: i32) -> (i32, i32) {
    %c0_i32 = arith.constant 0 : i32
    %c0_i32_0 = arith.constant 0 : i32
    %c0_i32_1 = arith.constant 0 : i32
    return %c0_i32, %c0_i32_0 : i32, i32
  }
  func.func @transform_16(%arg0: i32) -> (i32, i32) {
    %c0_i32 = arith.constant 0 : i32
    %c0_i32_0 = arith.constant 0 : i32
    %c0_i32_1 = arith.constant 0 : i32
    return %c0_i32, %c0_i32_0 : i32, i32
  }
}

</mosaic_0001>

<bundles_post_ra>
// kernel: vcl_multihead_forward.3
= control target key start
LH: loop header
LB: loop body
LE: loop exit
PB: predicated region body
PF: predicated region fallthrough
CT: control target
= control target key end

     0   :  { %s2438_s0 = inlined_call_operand.vmem [shape: f32[8,1024], index: 0, kind: input, shape index: {}]   ;;  %s2439_s1 = inlined_call_operand.vmem [shape: f32[8,64], index: 1, kind: input, shape index: {}]   ;;  %s2440_s2 = inlined_call_operand.vmem [shape: f32[8,32], index: 2, kind: input, shape index: {}]   ;;  %s2441_s3 = inlined_call_operand.vmem [shape: f32[8,10], index: 3, kind: input, shape index: {}]   ;;  %s2442_s4 = inlined_call_operand.hbm [shape: f32[64,1024], index: 4, kind: input, shape index: {}]   ;;  %s2443_s5 = inlined_call_operand.hbm [shape: f32[64,1024], index: 5, kind: input, shape index: {}]   ;;  %s2444_s6 = inlined_call_operand.vmem [shape: f32[1,64], index: 6, kind: input, shape index: {}]   ;;  %s2445_s7 = inlined_call_operand.vmem [shape: f32[1,64], index: 7, kind: input, shape index: {}]   ;;  %s2446_s8 = inlined_call_operand.vmem [shape: f32[32,64], index: 8, kind: input, shape index: {}]   ;;  %s2447_s9 = inlined_call_operand.vmem [shape: f32[32,64], index: 9, kind: input, shape index: {}]   ;;  %s2448_s10 = inlined_call_operand.vmem [shape: f32[1,32], index: 10, kind: input, shape index: {}]   ;;  %s2449_s11 = inlined_call_operand.vmem [shape: f32[1,32], index: 11, kind: input, shape index: {}]   ;;  %s2450_s12 = inlined_call_operand.vmem [shape: f32[10,32], index: 12, kind: input, shape index: {}]   ;;  %s2451_s13 = inlined_call_operand.vmem [shape: f32[10,32], index: 13, kind: input, shape index: {}]   ;;  %s2452_s14 = inlined_call_operand.vmem [shape: f32[1,10], index: 14, kind: input, shape index: {}]   ;;  %s2453_s15 = inlined_call_operand.vmem [shape: f32[1,10], index: 15, kind: input, shape index: {}]   ;;  %s2454_s16 = inlined_call_operand.vmem [shape: f32[8,10], index: 16, kind: output, shape index: {}]  }
   0x1   :  { %2456 = sst [smem:[#allocation8_spill]] %s2438_s0 }
   0x2   :  { %21 = vsyncpa [#allocation3], 0  ;;  %s35_s23 = sshll.u32 %s2442_s4, 4  ;;  %s36_s23 = int_to_ptr.hbm [resolvable:$true] %s35_s23 }
   0x3   :  { %22 = vsyncpa [#allocation5], 0  ;;  %s1882_s24 = smov [#allocation2]   ;;  %s48_s28 = sshll.u32 %s2443_s5, 4  ;;  %s49_s28 = int_to_ptr.hbm [resolvable:$true] %s48_s28 }
   0x4   :  { %s37_s25 = sshll.u32 %s1882_s24, 4  ;;  %s1883_s29 = smov 1024   ;;  %s38_s25 = int_to_ptr.vmem [resolvable:$true] %s37_s25 }
   0x5   :  { %s1884_s30 = smov 64   ;;  %s1885_s0 = smov [#allocation4]  }
   0x6   :  { %43 = dma.hbm_to_vmem [thread:$0]  %s36_s23, 8192, %s38_s25, [#allocation3], %s1883_s29, %s1883_s29, %s1884_s30  }
   0x7   :  { %s50_s17 = sshll.u32 %s1885_s0, 4  ;;  %s51_s17 = int_to_ptr.vmem [resolvable:$true] %s50_s17 }
   0x8   :  { %56 = dma.hbm_to_vmem [thread:$0]  %s49_s28, 8192, %s51_s17, [#allocation5], %s1883_s29, %s1883_s29, %s1884_s30  }
   0x9   :  { %1878 = dma.done.wait [#allocation3], 8192  }
   0xa   :  { %1879 = vsyncadd [#allocation3], 4294959104 }
   0xb   :  { %1880 = dma.done.wait [#allocation5], 8192  }
   0xc   :  { %1881 = vsyncadd [#allocation5], 4294959104  ;;  %v151_v0 = vld [vmem:[#allocation2 + $0x1d0] sm:$0xff]  ;;  %v149_v1 = vld [vmem:[#allocation2 + $0x1c0] sm:$0xff]  ;;  %s2457_s18 = sld [smem:[#allocation8_spill]]  ;;  %vm1238_vm0 = vcmask 523264  }
   0xd   :  { %v152_v2 = vld [vmem:[#allocation2 + $0x1d8] sm:$0xff]  ;;  %275 = vmatpush.xpose.msra.mxu2 %v151_v0  ;;  %235 = vmatpush.xpose.msra.mxu0 %v149_v1  ;;  %v150_v3 = vld [vmem:[#allocation2 + $0x1c8] sm:$0xff]  ;;  %v143_v4 = vld [vmem:[#allocation2 + $0x190] sm:$0xff]  ;;  %vm1389_vm3 = vcmask 261120   ;;  %vm1497_vm8 = vcmask 80896  }
   0xe   :  { %295 = vmatpush.xpose.msra.mxu3 %v152_v2  ;;  %255 = vmatpush.xpose.msra.mxu1 %v150_v3  ;;  %v141_v5 = vld [vmem:[#allocation2 + $0x180] sm:$0xff]  ;;  %v144_v6 = vld [vmem:[#allocation2 + $0x198] sm:$0xff]  ;;  %v142_v7 = vld [vmem:[#allocation2 + $0x188] sm:$0xff] }
   0xf   :  { %v135_v8 = vld [vmem:[#allocation2 + $0x150] sm:$0xff]  ;;  %v133_v9 = vld [vmem:[#allocation2 + $0x140] sm:$0xff]  ;;  %v136_v10 = vld [vmem:[#allocation2 + $0x158] sm:$0xff] }
  0x10   :  { %v134_v11 = vld [vmem:[#allocation2 + $0x148] sm:$0xff]  ;;  %v127_v12 = vld [vmem:[#allocation2 + $0x110] sm:$0xff]  ;;  %v125_v13 = vld [vmem:[#allocation2 + $0x100] sm:$0xff] }
  0x11   :  { %276 = vmatpush.xpose.msra.mxu2 %v143_v4  ;;  %236 = vmatpush.xpose.msra.mxu0 %v141_v5  ;;  %v128_v14 = vld [vmem:[#allocation2 + $0x118] sm:$0xff]  ;;  %v126_v15 = vld [vmem:[#allocation2 + $0x108] sm:$0xff]  ;;  %v119_v16 = vld [vmem:[#allocation2 + $0xd0] sm:$0xff] }
  0x12   :  { %296 = vmatpush.xpose.msra.mxu3 %v144_v6  ;;  %256 = vmatpush.xpose.msra.mxu1 %v142_v7  ;;  %v117_v17 = vld [vmem:[#allocation2 + $0xc0] sm:$0xff]  ;;  %v120_v18 = vld [vmem:[#allocation2 + $0xd8] sm:$0xff]  ;;  %v118_v19 = vld [vmem:[#allocation2 + $0xc8] sm:$0xff] }
  0x13   :  { %v111_v20 = vld [vmem:[#allocation2 + $0x90] sm:$0xff]  ;;  %v109_v22 = vld [vmem:[#allocation2 + $0x80] sm:$0xff]  ;;  %v1982_v25 = vld [vmem:[#allocation4 + $0x1d8] sm:$0xff] }
  0x14   :  { %v1977_v21 = vld [vmem:[#allocation4 + $0x1d0] sm:$0xff]  ;;  %v1980_v24 = vld [vmem:[#allocation4 + $0x1c0] sm:$0xff]  ;;  %v112_v26 = vld [vmem:[#allocation2 + $0x98] sm:$0xff]  ;;  %v510_v29 = vand.u32 2147483647, %v1982_v25 }
  0x15   :  { %277 = vmatpush.xpose.msra.mxu2 %v135_v8  ;;  %237 = vmatpush.xpose.msra.mxu0 %v133_v9  ;;  %v509_v23 = vand.u32 2147483647, %v1977_v21  ;;  %v110_v27 = vld [vmem:[#allocation2 + $0x88] sm:$0xff]  ;;  %v507_v28 = vand.u32 2147483647, %v1980_v24  ;;  %v1988_v32 = vld [vmem:[#allocation4 + $0x190] sm:$0xff] }
  0x16   :  { %297 = vmatpush.xpose.msra.mxu3 %v136_v10  ;;  %257 = vmatpush.xpose.msra.mxu1 %v134_v11  ;;  %v1986_v31 = vld [vmem:[#allocation4 + $0x1c8] sm:$0xff]  ;;  %v103_v33 = vld [vmem:[#allocation2 + $0x50] sm:$0xff]  ;;  %v574_v35 = vsub.f32 0.0, %v510_v29  ;;  %v101_v37 = vld [vmem:[#allocation2 + $0x40] sm:$0xff]  ;;  %v501_v39 = vand.u32 2147483647, %v1988_v32 }
  0x17   :  { %v573_v30 = vsub.f32 0.0, %v509_v23  ;;  %v571_v34 = vsub.f32 0.0, %v507_v28  ;;  %v508_v36 = vand.u32 2147483647, %v1986_v31  ;;  %v1992_v40 = vld [vmem:[#allocation4 + $0x180] sm:$0xff]  ;;  %v104_v41 = vld [vmem:[#allocation2 + $0x58] sm:$0xff] }
  0x18   :  { %v102_v42 = vld [vmem:[#allocation2 + $0x48] sm:$0xff]  ;;  %v697_v44 = vmul.f32 1.442695, %v574_v35  ;;  %v565_v46 = vsub.f32 0.0, %v501_v39  ;;  %v95_v47 = vld [vmem:[#allocation2 + $0x10] sm:$0xff]  ;;  %v1995_v49 = vld [vmem:[#allocation4 + $0x198] sm:$0xff] }
  0x19   :  { %278 = vmatpush.xpose.msra.mxu2 %v127_v12  ;;  %238 = vmatpush.xpose.msra.mxu0 %v125_v13  ;;  %v695_v38 = vmul.f32 1.442695, %v573_v30  ;;  %v691_v43 = vmul.f32 1.442695, %v571_v34  ;;  %v572_v45 = vsub.f32 0.0, %v508_v36  ;;  %v1997_v50 = vld [vmem:[#allocation4 + $0x188] sm:$0xff] }
  0x1a   :  { %298 = vmatpush.xpose.msra.mxu3 %v128_v14  ;;  %258 = vmatpush.xpose.msra.mxu1 %v126_v15  ;;  %v499_v48 = vand.u32 2147483647, %v1992_v40  ;;  %v155_v51 = vld [vmem:[#allocation2 + $0x1f0] sm:$0xff]  ;;  %v93_v52 = vld [vmem:[#allocation2] sm:$0xff]  ;;  %v679_v54 = vmul.f32 1.442695, %v565_v46 }
  0x1b   :  { %1528 = vpow2.f32 %v695_v38  ;;  %v693_v53 = vmul.f32 1.442695, %v572_v45  ;;  %v96_v55 = vld [vmem:[#allocation2 + $0x18] sm:$0xff]  ;;  %v153_v56 = vld [vmem:[#allocation2 + $0x1e0] sm:$0xff]  ;;  %v94_v59 = vld [vmem:[#allocation2 + $0x8] sm:$0xff]  ;;  %v445_v5 = vmax.f32 %v1977_v21, 0.0 }
  0x1c   :  { %1530 = vpow2.f32 %v691_v43  ;;  %v156_v57 = vld [vmem:[#allocation2 + $0x1f8] sm:$0xff]  ;;  %v563_v58 = vsub.f32 0.0, %v499_v48  ;;  %v502_v60 = vand.u32 2147483647, %v1995_v49  ;;  %v500_v61 = vand.u32 2147483647, %v1997_v50 }
  0x1d   :  { %279 = vmatpush.xpose.msra.mxu2 %v119_v16  ;;  %239 = vmatpush.xpose.msra.mxu0 %v117_v17  ;;  %1532 = vpow2.f32 %v697_v44  ;;  %v2001_v62 = vld [vmem:[#allocation4 + $0x150] sm:$0xff]  ;;  %v154_v63 = vld [vmem:[#allocation2 + $0x1e8] sm:$0xff]  ;;  %v145_v4 = vld [vmem:[#allocation2 + $0x1a0] sm:$0xff]  ;;  %v443_v7 = vmax.f32 %v1980_v24, 0.0  ;;  %v446_v8 = vmax.f32 %v1982_v25, 0.0  ;;  %v435_v36 = vmax.f32 %v1992_v40, 0.0 }
  0x1e   :  { %299 = vmatpush.xpose.msra.mxu3 %v120_v18  ;;  %259 = vmatpush.xpose.msra.mxu1 %v118_v19  ;;  %1534 = vpow2.f32 %v693_v53  ;;  %v147_v0 = vld [vmem:[#allocation2 + $0x1b0] sm:$0xff]  ;;  %v675_v2 = vmul.f32 1.442695, %v563_v58  ;;  %v85_v6 = vld [vmem:[%s2457_s18] sm:$0xff]  ;;  %v566_v9 = vsub.f32 0.0, %v502_v60  ;;  %v88_v13 = vld [vmem:[%s2457_s18 + $0x18] sm:$0xff] }
  0x1f   :  { %v87_v1 = vld [vmem:[%s2457_s18 + $0x10] sm:$0xff]  ;;  %1536 = vpow2.f32 %v679_v54  ;;  %v2012_v10 = vld [vmem:[#allocation4 + $0x140] sm:$0xff]  ;;  %v564_v14 = vsub.f32 0.0, %v500_v61  ;;  %v493_v15 = vand.u32 2147483647, %v2001_v62  ;;  %v2018_v16 = vld [vmem:[#allocation4 + $0x158] sm:$0xff] }
  0x20   :  { %1538 = vpow2.f32 %v675_v2  ;;  %v148_v18 = vld [vmem:[#allocation2 + $0x1b8] sm:$0xff]  ;;  %v681_v23 = vmul.f32 1.442695, %v566_v9  ;;  %v86_v28 = vld [vmem:[%s2457_s18 + $0x8] sm:$0xff]  ;;  %v491_v30 = vand.u32 2147483647, %v2012_v10  ;;  %v2031_v46 = vmul.f32 %v87_v1, %v87_v1 }
  0x21   :  { %280 = vmatpush.xpose.msra.mxu2 %v111_v20  ;;  %240 = vmatpush.xpose.msra.mxu0 %v109_v22  ;;  %v1529_v3 = vpop.eup %1528  ;;  %v444_v20 = vmax.f32 %v1986_v31, 0.0  ;;  %v437_v22 = vmax.f32 %v1988_v32, 0.0  ;;  %v557_v29 = vsub.f32 0.0, %v493_v15  ;;  %v139_v34 = vld [vmem:[#allocation2 + $0x170] sm:$0xff]  ;;  %v137_v35 = vld [vmem:[#allocation2 + $0x160] sm:$0xff]  ;;  %v2029_v45 = vld [vmem:[#allocation4 + $0x148] sm:$0xff]  ;;  %v2043_v9 = vmul.f32 %v86_v28, %v86_v28 }
  0x22   :  { %300 = vmatpush.xpose.msra.mxu3 %v112_v26  ;;  %260 = vmatpush.xpose.msra.mxu1 %v110_v27  ;;  %v1531_v11 = vpop.eup %1530  ;;  %v765_v12 = vadd.f32 1.0, %v1529_v3  ;;  %v146_v26 = vld [vmem:[#allocation2 + $0x1a8] sm:$0xff]  ;;  %v494_v38 = vand.u32 2147483647, %v2018_v16  ;;  %v677_v43 = vmul.f32 1.442695, %v564_v14 }
  0x23   :  { %v1533_v17 = vpop.eup %1532  ;;  %v763_v19 = vadd.f32 1.0, %v1531_v11  ;;  %v555_v44 = vsub.f32 0.0, %v491_v30  ;;  %v2033_v48 = vld [vmem:[#allocation4 + $0x110] sm:$0xff]  ;;  %v663_v53 = vmul.f32 1.442695, %v557_v29  ;;  %v129_v3 = vld [vmem:[#allocation2 + $0x120] sm:$0xff] }
  0x24   :  { %1540 = vlog2.f32 %v765_v12  ;;  %v766_v27 = vadd.f32 1.0, %v1533_v17  ;;  %v492_v58 = vand.u32 2147483647, %v2029_v45  ;;  %v131_v61 = vld [vmem:[#allocation2 + $0x130] sm:$0xff]  ;;  %v427_v21 = vmax.f32 %v2012_v10, 0.0  ;;  %v113_v24 = vld [vmem:[#allocation2 + $0xa0] sm:$0xff] }
  0x25   :  { %281 = vmatpush.xpose.msra.mxu2 %v103_v33  ;;  %241 = vmatpush.xpose.msra.mxu0 %v101_v37  ;;  %v1535_v33 = vpop.eup %1534  ;;  %1542 = vlog2.f32 %v763_v19  ;;  %v438_v37 = vmax.f32 %v1995_v49, 0.0  ;;  %v659_v54 = vmul.f32 1.442695, %v555_v44 }
  0x26   :  { %301 = vmatpush.xpose.msra.mxu3 %v104_v41  ;;  %261 = vmatpush.xpose.msra.mxu1 %v102_v42  ;;  %v1537_v39 = vpop.eup %1536  ;;  %v140_v41 = vld [vmem:[#allocation2 + $0x178] sm:$0xff]  ;;  %1544 = vlog2.f32 %v766_v27  ;;  %v764_v42 = vadd.f32 1.0, %v1535_v33  ;;  %v556_v11 = vsub.f32 0.0, %v492_v58  ;;  %v115_v58 = vld [vmem:[#allocation2 + $0xb0] sm:$0xff] }
  0x27   :  { %1546 = vpow2.f32 %v681_v23  ;;  %v436_v23 = vmax.f32 %v1997_v50, 0.0  ;;  %v91_v50 = vld [vmem:[%s2457_s18 + $0x30] sm:$0xff] }
  0x28   :  { %1548 = vlog2.f32 %v764_v42 }
  0x29   :  { %282 = vmatpush.xpose.msra.mxu2 %v95_v47  ;;  %242 = vmatpush.xpose.msra.mxu0 %v93_v52  ;;  %v757_v47 = vadd.f32 1.0, %v1537_v39  ;;  %v138_v52 = vld [vmem:[#allocation2 + $0x168] sm:$0xff]  ;;  %v429_v39 = vmax.f32 %v2001_v62, 0.0 }
  0x2a   :  { %302 = vmatpush.xpose.msra.mxu3 %v96_v55  ;;  %262 = vmatpush.xpose.msra.mxu1 %v94_v59  ;;  %v558_v55 = vsub.f32 0.0, %v494_v38  ;;  %v2038_v59 = vld [vmem:[#allocation4 + $0x100] sm:$0xff]  ;;  %v124_v38 = vld [vmem:[#allocation2 + $0xf8] sm:$0xff] }
  0x2b   :  { %1550 = vlog2.f32 %v757_v47  ;;  %v2054_v47 = vld [vmem:[#allocation4 + $0x118] sm:$0xff] }
  0x2c   :  { %283 = vmatmul.f32.vlgmr.msra.gmra.mxu2 %v87_v1  ;;  %243 = vmatmul.f32.vlgmr.msra.gmra.mxu0 %v85_v6  ;;  %1552 = vpow2.f32 %v677_v43  ;;  %v485_v1 = vand.u32 2147483647, %v2033_v48  ;;  %v422_v10 = vmax.f32 %v2054_v47, 0.0 }
  0x2d   :  { %355 = vmatpush.xpose.msrb.mxu2 %v155_v51  ;;  %315 = vmatpush.xpose.msrb.mxu0 %v153_v56  ;;  %v1539_v51 = vpop.eup %1538  ;;  %v2035_v56 = vmul.f32 %v85_v6, %v85_v6 }
  0x2e   :  { %375 = vmatpush.xpose.msrb.mxu3 %v156_v57  ;;  %335 = vmatpush.xpose.msrb.mxu1 %v154_v63  ;;  %v755_v57 = vadd.f32 1.0, %v1539_v51  ;;  %v1541_v60 = vpop.eup %1540  ;;  %v2040_v63 = vmul.f32 %v88_v13, %v88_v13  ;;  %v549_v15 = vsub.f32 0.0, %v485_v1 }
  0x2f   :  { %303 = vmatmul.f32.vlgmr.msra.gmra.mxu3 %v88_v13  ;;  %263 = vmatmul.f32.vlgmr.msra.gmra.mxu1 %v86_v28  ;;  %v1543_v2 = vpop.eup %1542  ;;  %v888_v6 = vmul.f32 0.6931472, %v1541_v60  ;;  %v483_v13 = vand.u32 2147483647, %v2038_v59  ;;  %v123_v28 = vld [vmem:[#allocation2 + $0xf0] sm:$0xff] }
  0x30   :  { %1554 = vlog2.f32 %v755_v57  ;;  %v1545_v12 = vpop.eup %1544  ;;  %v884_v14 = vmul.f32 0.6931472, %v1543_v2  ;;  %v647_v33 = vmul.f32 1.442695, %v549_v15 }
  0x31   :  { %356 = vmatpush.xpose.msrb.mxu2 %v147_v0  ;;  %316 = vmatpush.xpose.msrb.mxu0 %v145_v4  ;;  %v665_v0 = vmul.f32 1.442695, %v558_v55  ;;  %v132_v4 = vld [vmem:[#allocation2 + $0x138] sm:$0xff]  ;;  %1556 = vpow2.f32 %v663_v53  ;;  %v1547_v17 = vpop.eup %1546  ;;  %v957_v19 = vadd.f32 %v888_v6, %v445_v5  ;;  %v890_v29 = vmul.f32 0.6931472, %v1545_v12 }
  0x32   :  { %376 = vmatpush.xpose.msrb.mxu3 %v148_v18  ;;  %336 = vmatpush.xpose.msrb.mxu1 %v146_v26  ;;  %v130_v18 = vld [vmem:[#allocation2 + $0x128] sm:$0xff]  ;;  %1558 = vpow2.f32 %v659_v54  ;;  %v661_v26 = vmul.f32 1.442695, %v556_v11  ;;  %v1549_v27 = vpop.eup %1548  ;;  %v758_v30 = vadd.f32 1.0, %v1547_v17  ;;  %v430_v5 = vmax.f32 %v2018_v16, 0.0 }
  0x33   :  { %1560 = vpow2.f32 %v665_v0  ;;  %v955_v42 = vadd.f32 %v884_v14, %v443_v7  ;;  %v886_v43 = vmul.f32 0.6931472, %v1549_v27  ;;  %v547_v44 = vsub.f32 0.0, %v483_v13  ;;  %v116_v7 = vld [vmem:[#allocation2 + $0xb8] sm:$0xff]  ;;  %v2064_v11 = vld [vmem:[#allocation4 + $0x108] sm:$0xff] }
  0x34   :  { %1562 = vpow2.f32 %v661_v26  ;;  %v428_v54 = vmax.f32 %v2029_v45, 0.0  ;;  %v421_v55 = vmax.f32 %v2033_v48, 0.0  ;;  %v2058_v60 = vmul.f32 %v957_v19, %v957_v19  ;;  %v114_v13 = vld [vmem:[#allocation2 + $0xa8] sm:$0xff]  ;;  %v2070_v26 = vld [vmem:[#allocation4 + $0xd0] sm:$0xff] }
  0x35   :  { %357 = vmatpush.xpose.msrb.mxu2 %v139_v34  ;;  %317 = vmatpush.xpose.msrb.mxu0 %v137_v35  ;;  %v1551_v34 = vpop.eup %1550  ;;  %v121_v35 = vld [vmem:[#allocation2 + $0xe0] sm:$0xff]  ;;  %1564 = vlog2.f32 %v758_v30  ;;  %v419_v0 = vmax.f32 %v2038_v59, 0.0  ;;  %v643_v1 = vmul.f32 1.442695, %v547_v44  ;;  %v486_v6 = vand.u32 2147483647, %v2054_v47 }
  0x36   :  { %377 = vmatpush.xpose.msrb.mxu3 %v140_v41  ;;  %337 = vmatpush.xpose.msrb.mxu1 %v138_v52  ;;  %v1553_v41 = vpop.eup %1552  ;;  %v122_v52 = vld [vmem:[#allocation2 + $0xe8] sm:$0xff]  ;;  %1566 = vpow2.f32 %v647_v33  ;;  %v2066_v14 = vmul.f32 %v955_v42, %v955_v42  ;;  %v956_v15 = vadd.f32 %v886_v43, %v444_v20  ;;  %v484_v20 = vand.u32 2147483647, %v2064_v11  ;;  %v2075_v30 = vld [vmem:[#allocation4 + $0xc0] sm:$0xff] }
  0x37   :  { %v1555_v51 = vpop.eup %1554  ;;  %v756_v53 = vadd.f32 1.0, %v1553_v41  ;;  %v550_v19 = vsub.f32 0.0, %v486_v6  ;;  %v475_v32 = vand.u32 2147483647, %v2075_v30 }
  0x38   :  { %v1557_v57 = vpop.eup %1556  ;;  %v868_v17 = vmul.f32 0.6931472, %v1555_v51  ;;  %v548_v44 = vsub.f32 0.0, %v484_v20  ;;  %v477_v51 = vand.u32 2147483647, %v2070_v26 }
  0x39   :  { %358 = vmatpush.xpose.msrb.mxu2 %v131_v61  ;;  %318 = vmatpush.xpose.msrb.mxu0 %v129_v3  ;;  %v958_v61 = vadd.f32 %v890_v29, %v446_v8  ;;  %v1559_v2 = vpop.eup %1558  ;;  %v872_v3 = vmul.f32 0.6931472, %v1551_v34  ;;  %1568 = vlog2.f32 %v756_v53  ;;  %v105_v34 = vld [vmem:[#allocation2 + $0x60] sm:$0xff]  ;;  %v649_v42 = vmul.f32 1.442695, %v550_v19  ;;  %v106_v53 = vld [vmem:[#allocation2 + $0x68] sm:$0xff] }
  0x3a   :  { %378 = vmatpush.xpose.msrb.mxu3 %v132_v4  ;;  %338 = vmatpush.xpose.msrb.mxu1 %v130_v18  ;;  %v749_v4 = vadd.f32 1.0, %v1557_v57  ;;  %v1561_v12 = vpop.eup %1560  ;;  %v747_v25 = vadd.f32 1.0, %v1559_v2  ;;  %1570 = vpow2.f32 %v643_v1  ;;  %v99_v57 = vld [vmem:[#allocation2 + $0x30] sm:$0xff]  ;;  %v541_v1 = vsub.f32 0.0, %v477_v51  ;;  %v2083_v2 = vld [vmem:[#allocation4 + $0xd8] sm:$0xff] }
  0x3b   :  { %v1563_v8 = vpop.eup %1562  ;;  %v750_v18 = vadd.f32 1.0, %v1561_v12  ;;  %v2072_v29 = vmul.f32 %v958_v61, %v958_v61  ;;  %v645_v61 = vmul.f32 1.442695, %v548_v44  ;;  %v478_v49 = vand.u32 2147483647, %v2083_v2  ;;  %v90_v44 = vld [vmem:[%s2457_s18 + $0x28] sm:$0xff] }
  0x3c   :  { %1572 = vlog2.f32 %v749_v4  ;;  %v1565_v27 = vpop.eup %1564  ;;  %v748_v31 = vadd.f32 1.0, %v1563_v8  ;;  %v97_v4 = vld [vmem:[#allocation2 + $0x20] sm:$0xff]  ;;  %v98_v8 = vld [vmem:[#allocation2 + $0x28] sm:$0xff] }
  0x3d   :  { %359 = vmatpush.xpose.msrb.mxu2 %v123_v28  ;;  %319 = vmatpush.xpose.msrb.mxu0 %v121_v35  ;;  %v107_v28 = vld [vmem:[#allocation2 + $0x70] sm:$0xff]  ;;  %1574 = vlog2.f32 %v747_v25  ;;  %v1567_v33 = vpop.eup %1566  ;;  %v108_v35 = vld [vmem:[#allocation2 + $0x78] sm:$0xff]  ;;  %v874_v41 = vmul.f32 0.6931472, %v1565_v27 }
  0x3e   :  { %379 = vmatpush.xpose.msrb.mxu3 %v124_v38  ;;  %339 = vmatpush.xpose.msrb.mxu1 %v122_v52  ;;  %v949_v38 = vadd.f32 %v872_v3, %v437_v22  ;;  %1576 = vlog2.f32 %v750_v18  ;;  %v741_v43 = vadd.f32 1.0, %v1567_v33  ;;  %v100_v25 = vld [vmem:[#allocation2 + $0x38] sm:$0xff]  ;;  %v631_v18 = vmul.f32 1.442695, %v541_v1 }
  0x3f   :  { %1578 = vlog2.f32 %v748_v31  ;;  %v1569_v52 = vpop.eup %1568  ;;  %v950_v12 = vadd.f32 %v874_v41, %v438_v37  ;;  %v2102_v41 = vld [vmem:[#allocation4 + $0xc8] sm:$0xff] }
  0x40   :  { %1580 = vpow2.f32 %v649_v42  ;;  %v1571_v22 = vpop.eup %1570  ;;  %v1030_v6 = vmul.f32 %v949_v38, %v949_v38  ;;  %v542_v38 = vsub.f32 0.0, %v478_v49  ;;  %v413_v49 = vmax.f32 %v2070_v26, 0.0 }
  0x41   :  { %360 = vmatpush.xpose.msrb.mxu2 %v115_v58  ;;  %320 = vmatpush.xpose.msrb.mxu0 %v113_v24  ;;  %v1037_v58 = vmul.f32 %v956_v15, %v956_v15  ;;  %v947_v24 = vadd.f32 %v868_v17, %v435_v36  ;;  %1582 = vlog2.f32 %v741_v43  ;;  %v739_v40 = vadd.f32 1.0, %v1571_v22 }
  0x42   :  { %380 = vmatpush.xpose.msrb.mxu3 %v116_v7  ;;  %340 = vmatpush.xpose.msrb.mxu1 %v114_v13  ;;  %v870_v7 = vmul.f32 0.6931472, %v1569_v52  ;;  %v1573_v3 = vpop.eup %1572  ;;  %v539_v36 = vsub.f32 0.0, %v475_v32  ;;  %1584 = vpow2.f32 %v645_v61  ;;  %v633_v52 = vmul.f32 1.442695, %v542_v38 }
  0x43   :  { %v1575_v15 = vpop.eup %1574  ;;  %v856_v17 = vmul.f32 0.6931472, %v1573_v3  ;;  %1586 = vlog2.f32 %v739_v40  ;;  %v1028_v31 = vmul.f32 %v947_v24, %v947_v24  ;;  %v2119_v24 = vld [vmem:[#allocation4 + $0x80] sm:$0xff]  ;;  %v412_v47 = vmax.f32 %v2102_v41, 0.0 }
  0x44   :  { %v948_v13 = vadd.f32 %v870_v7, %v436_v23  ;;  %v1577_v19 = vpop.eup %1576  ;;  %v852_v27 = vmul.f32 0.6931472, %v1575_v15  ;;  %1588 = vpow2.f32 %v631_v18  ;;  %v467_v48 = vand.u32 2147483647, %v2119_v24 }
  0x45   :  { %361 = vmatpush.xpose.msrb.mxu2 %v107_v28  ;;  %321 = vmatpush.xpose.msrb.mxu0 %v105_v34  ;;  %v627_v28 = vmul.f32 1.442695, %v539_v36  ;;  %v1579_v37 = vpop.eup %1578  ;;  %v941_v23 = vadd.f32 %v856_v17, %v429_v39  ;;  %v858_v20 = vmul.f32 0.6931472, %v1577_v19  ;;  %v89_v34 = vld [vmem:[%s2457_s18 + $0x20] sm:$0xff]  ;;  %v1031_v39 = vmul.f32 %v950_v12, %v950_v12  ;;  %v2131_v19 = vld [vmem:[#allocation4 + $0x88] sm:$0xff] }
  0x46   :  { %381 = vmatpush.xpose.msrb.mxu3 %v108_v35  ;;  %341 = vmatpush.xpose.msrb.mxu1 %v106_v53  ;;  %v1581_v33 = vpop.eup %1580  ;;  %v854_v35 = vmul.f32 0.6931472, %v1579_v37  ;;  %v1029_v43 = vmul.f32 %v948_v13, %v948_v13  ;;  %v2116_v53 = vld [vmem:[#allocation4 + $0x90] sm:$0xff]  ;;  %v420_v13 = vmax.f32 %v2064_v11, 0.0  ;;  %v531_v17 = vsub.f32 0.0, %v467_v48 }
  0x47   :  { %1590 = vpow2.f32 %v627_v28  ;;  %v1583_v62 = vpop.eup %1582  ;;  %v942_v42 = vadd.f32 %v858_v20, %v430_v5  ;;  %v1022_v16 = vmul.f32 %v941_v23, %v941_v23  ;;  %v411_v23 = vmax.f32 %v2075_v30, 0.0 }
  0x48   :  { %v840_v51 = vmul.f32 0.6931472, %v1583_v62  ;;  %v611_v11 = vmul.f32 1.442695, %v531_v17  ;;  %v2155_v17 = vld [vmem:[#allocation4 + $0x1f0] sm:$0xff] }
  0x49   :  { %362 = vmatpush.xpose.msrb.mxu2 %v99_v57  ;;  %322 = vmatpush.xpose.msrb.mxu0 %v97_v4  ;;  %v1585_v57 = vpop.eup %1584  ;;  %v1023_v22 = vmul.f32 %v942_v42, %v942_v42  ;;  %v469_v4 = vand.u32 2147483647, %v2116_v53 }
  0x4a   :  { %382 = vmatpush.xpose.msrb.mxu3 %v100_v25  ;;  %342 = vmatpush.xpose.msrb.mxu1 %v98_v8  ;;  %v1587_v32 = vpop.eup %1586  ;;  %v933_v45 = vadd.f32 %v840_v51, %v421_v55 }
  0x4b   :  { %v1589_v7 = vpop.eup %1588  ;;  %v836_v1 = vmul.f32 0.6931472, %v1587_v32  ;;  %v533_v8 = vsub.f32 0.0, %v469_v4 }
  0x4c   :  { %363 = vmatmul.f32.vlgmr.msrb.gmra.mxu2 %v91_v50  ;;  %323 = vmatmul.f32.vlgmr.msrb.gmra.mxu0 %v89_v34  ;;  %v1014_v40 = vmul.f32 %v933_v45, %v933_v45  ;;  %v733_v36 = vadd.f32 1.0, %v1589_v7  ;;  %v2138_v34 = vld [vmem:[#allocation4 + $0x40] sm:$0xff]  ;;  %v2149_v7 = vld [vmem:[#allocation4 + $0x48] sm:$0xff] }
  0x4d   :  { %1096 = vmatpush.xpose.msra.mxu2 %v2058_v60  ;;  %1056 = vmatpush.xpose.msra.mxu0 %v2066_v14  ;;  %v939_v60 = vadd.f32 %v852_v27, %v427_v21  ;;  %v92_v14 = vld [vmem:[%s2457_s18 + $0x38] sm:$0xff]  ;;  %v742_v21 = vadd.f32 1.0, %v1581_v33  ;;  %v1591_v12 = vpop.eup %1590  ;;  %v931_v55 = vadd.f32 %v836_v1, %v419_v0  ;;  %v615_v59 = vmul.f32 1.442695, %v533_v8  ;;  %v2134_v0 = vld [vmem:[#allocation4 + $0x50] sm:$0xff] }
  0x4e   :  { %1116 = vmatpush.xpose.msra.mxu3 %v2072_v29  ;;  %1076 = vmatpush.xpose.msra.mxu1 %v1037_v58  ;;  %v940_v29 = vadd.f32 %v854_v35, %v428_v54  ;;  %v476_v58 = vand.u32 2147483647, %v2102_v41  ;;  %v740_v54 = vadd.f32 1.0, %v1585_v57  ;;  %v731_v15 = vadd.f32 1.0, %v1591_v12 }
  0x4f   :  { %v1020_v5 = vmul.f32 %v939_v60, %v939_v60  ;;  %1592 = vlog2.f32 %v742_v21  ;;  %383 = vmatmul.f32.vlgmr.msrb.gmra.mxu3 %v92_v14  ;;  %343 = vmatmul.f32.vlgmr.msrb.gmra.mxu1 %v90_v44  ;;  %v1012_v28 = vmul.f32 %v931_v55, %v931_v55  ;;  %v468_v33 = vand.u32 2147483647, %v2131_v19  ;;  %v2152_v55 = vld [vmem:[#allocation4 + $0x10] sm:$0xff] }
  0x50   :  { %1594 = vpow2.f32 %v633_v52  ;;  %v1021_v61 = vmul.f32 %v940_v29, %v940_v29  ;;  %v540_v3 = vsub.f32 0.0, %v476_v58  ;;  %v461_v38 = vand.u32 2147483647, %v2134_v0  ;;  %v2146_v52 = vld [vmem:[#allocation4 + $0x58] sm:$0xff] }
  0x51   :  { %1097 = vmatpush.xpose.msra.mxu2 %v1030_v6  ;;  %1057 = vmatpush.xpose.msra.mxu0 %v1028_v31  ;;  %v2124_v6 = vld [vmem:[#allocation4 + $0x98] sm:$0xff]  ;;  %1596 = vlog2.f32 %v740_v54  ;;  %v532_v30 = vsub.f32 0.0, %v468_v33  ;;  %v462_v48 = vand.u32 2147483647, %v2146_v52 }
  0x52   :  { %1117 = vmatpush.xpose.msra.mxu3 %v1031_v39  ;;  %1077 = vmatpush.xpose.msra.mxu1 %v1029_v43  ;;  %v629_v25 = vmul.f32 1.442695, %v540_v3  ;;  %1598 = vlog2.f32 %v733_v36  ;;  %v470_v18 = vand.u32 2147483647, %v2124_v6  ;;  %v414_v39 = vmax.f32 %v2083_v2, 0.0 }
  0x53   :  { %1600 = vlog2.f32 %v731_v15  ;;  %v525_v21 = vsub.f32 0.0, %v461_v38  ;;  %v459_v43 = vand.u32 2147483647, %v2138_v34  ;;  %v405_v2 = vmax.f32 %v2116_v53, 0.0 }
  0x54   :  { %1602 = vpow2.f32 %v629_v25  ;;  %v534_v50 = vsub.f32 0.0, %v470_v18  ;;  %v403_v18 = vmax.f32 %v2119_v24, 0.0 }
  0x55   :  { %1098 = vmatpush.xpose.msra.mxu2 %v1022_v16  ;;  %1058 = vmatpush.xpose.msra.mxu0 %v1020_v5  ;;  %v1593_v27 = vpop.eup %1592  ;;  %1604 = vpow2.f32 %v615_v59  ;;  %v599_v5 = vmul.f32 1.442695, %v525_v21  ;;  %v523_v58 = vsub.f32 0.0, %v459_v43 }
  0x56   :  { %1118 = vmatpush.xpose.msra.mxu3 %v1023_v22  ;;  %v1595_v37 = vpop.eup %1594  ;;  %1078 = vmatpush.xpose.msra.mxu1 %v1021_v61  ;;  %v842_v31 = vmul.f32 0.6931472, %v1593_v27  ;;  %1606 = vpow2.f32 %v611_v11  ;;  %v617_v35 = vmul.f32 1.442695, %v534_v50  ;;  %v406_v11 = vmax.f32 %v2124_v6, 0.0 }
  0x57   :  { %v734_v20 = vadd.f32 1.0, %v1595_v37  ;;  %v1597_v26 = vpop.eup %1596  ;;  %v595_v4 = vmul.f32 1.442695, %v523_v58  ;;  %v453_v37 = vand.u32 2147483647, %v2152_v55 }
  0x58   :  { %v934_v60 = vadd.f32 %v842_v31, %v422_v10  ;;  %v838_v62 = vmul.f32 0.6931472, %v1597_v26  ;;  %v1599_v14 = vpop.eup %1598  ;;  %v613_v10 = vmul.f32 1.442695, %v532_v30 }
  0x59   :  { %1099 = vmatpush.xpose.msra.mxu2 %v1014_v40  ;;  %1059 = vmatpush.xpose.msra.mxu0 %v1012_v28  ;;  %1608 = vlog2.f32 %v734_v20  ;;  %v1601_v44 = vpop.eup %1600  ;;  %v824_v51 = vmul.f32 0.6931472, %v1599_v14  ;;  %v526_v28 = vsub.f32 0.0, %v462_v48  ;;  %v2161_v20 = vld [vmem:[#allocation4] sm:$0xff]  ;;  %v2164_v14 = vld [vmem:[#allocation4 + $0x18] sm:$0xff] }
  0x5a   :  { %v1015_v42 = vmul.f32 %v934_v60, %v934_v60  ;;  %1610 = vpow2.f32 %v617_v35  ;;  %v932_v29 = vadd.f32 %v838_v62, %v420_v13  ;;  %v1603_v57 = vpop.eup %1602  ;;  %v820_v16 = vmul.f32 0.6931472, %v1601_v44  ;;  %v2176_v48 = vld [vmem:[#allocation4 + $0x1f8] sm:$0xff] }
  0x5b   :  { %v1605_v32 = vpop.eup %1604  ;;  %v925_v45 = vadd.f32 %v824_v51, %v413_v49  ;;  %v732_v54 = vadd.f32 1.0, %v1603_v57  ;;  %1612 = vpow2.f32 %v613_v10  ;;  %v460_v13 = vand.u32 2147483647, %v2149_v7 }
  0x5c   :  { %1119 = vmatpush.xpose.msra.mxu3 %v1015_v42  ;;  %v1013_v22 = vmul.f32 %v932_v29, %v932_v29  ;;  %v1607_v61 = vpop.eup %1606  ;;  %v923_v1 = vadd.f32 %v820_v16, %v411_v23  ;;  %v725_v3 = vadd.f32 1.0, %v1605_v32  ;;  %1614 = vpow2.f32 %v599_v5 }
  0x5d   :  { %v1006_v40 = vmul.f32 %v925_v45, %v925_v45  ;;  %1616 = vlog2.f32 %v732_v54  ;;  %v723_v36 = vadd.f32 1.0, %v1607_v61  ;;  %v524_v59 = vsub.f32 0.0, %v460_v13 }
  0x5e   :  { %1079 = vmatpush.xpose.msra.mxu1 %v1013_v22  ;;  %v1004_v25 = vmul.f32 %v923_v1, %v923_v1  ;;  %1618 = vlog2.f32 %v725_v3  ;;  %v601_v50 = vmul.f32 1.442695, %v526_v28  ;;  %v513_v23 = vand.u32 2147483647, %v2155_v17  ;;  %v2173_v1 = vld [vmem:[#allocation4 + $0x1e0] sm:$0xff] }
  0x5f   :  { %v1609_v12 = vpop.eup %1608  ;;  %1100 = vmatpush.xpose.msra.mxu2 %v1006_v40  ;;  %1620 = vlog2.f32 %v723_v36  ;;  %v597_v60 = vmul.f32 1.442695, %v524_v59  ;;  %v517_v35 = vsub.f32 0.0, %v453_v37  ;;  %v404_v62 = vmax.f32 %v2131_v19, 0.0 }
  0x60   :  { %v1611_v15 = vpop.eup %1610  ;;  %v826_v8 = vmul.f32 0.6931472, %v1609_v12  ;;  %1060 = vmatpush.xpose.msra.mxu0 %v1004_v25  ;;  %1622 = vpow2.f32 %v595_v4  ;;  %v577_v30 = vsub.f32 0.0, %v513_v23  ;;  %v451_v43 = vand.u32 2147483647, %v2161_v20 }
  0x61   :  { %v726_v27 = vadd.f32 1.0, %v1611_v15  ;;  %v1613_v31 = vpop.eup %1612  ;;  %v583_v21 = vmul.f32 1.442695, %v517_v35  ;;  %v397_v51 = vmax.f32 %v2134_v0, 0.0  ;;  %v454_v45 = vand.u32 2147483647, %v2164_v14 }
  0x62   :  { %v926_v49 = vadd.f32 %v826_v8, %v414_v39  ;;  %v1615_v33 = vpop.eup %1614  ;;  %v724_v26 = vadd.f32 1.0, %v1613_v31  ;;  %v703_v10 = vmul.f32 1.442695, %v577_v30  ;;  %v515_v5 = vsub.f32 0.0, %v451_v43 }
  0x63   :  { %1624 = vlog2.f32 %v726_v27  ;;  %v1617_v38 = vpop.eup %1616  ;;  %v717_v39 = vadd.f32 1.0, %v1615_v33  ;;  %v518_v4 = vsub.f32 0.0, %v454_v45  ;;  %v511_v13 = vand.u32 2147483647, %v2173_v1 }
  0x64   :  { %v1007_v24 = vmul.f32 %v926_v49, %v926_v49  ;;  %1626 = vpow2.f32 %v601_v50  ;;  %v1619_v6 = vpop.eup %1618  ;;  %v822_v42 = vmul.f32 0.6931472, %v1617_v38  ;;  %v398_v49 = vmax.f32 %v2146_v52, 0.0 }
  0x65   :  { %1628 = vlog2.f32 %v724_v26  ;;  %v1621_v44 = vpop.eup %1620  ;;  %v808_v29 = vmul.f32 0.6931472, %v1619_v6  ;;  %v585_v8 = vmul.f32 1.442695, %v518_v4  ;;  %v575_v31 = vsub.f32 0.0, %v511_v13  ;;  %v2182_v26 = vld [vmem:[#allocation4 + $0x8] sm:$0xff] }
  0x66   :  { %1120 = vmatpush.xpose.msra.mxu3 %v1007_v24  ;;  %1630 = vlog2.f32 %v717_v39  ;;  %v1623_v57 = vpop.eup %1622  ;;  %v924_v19 = vadd.f32 %v822_v42, %v412_v47  ;;  %v804_v16 = vmul.f32 0.6931472, %v1621_v44  ;;  %v579_v47 = vmul.f32 1.442695, %v515_v5  ;;  %v2189_v44 = vld [vmem:[#allocation4 + $0x1b0] sm:$0xff] }
  0x67   :  { %1632 = vpow2.f32 %v597_v60  ;;  %v917_v32 = vadd.f32 %v808_v29, %v405_v2  ;;  %v715_v22 = vadd.f32 1.0, %v1623_v57  ;;  %v395_v2 = vmax.f32 %v2138_v34, 0.0  ;;  %v2184_v60 = vld [vmem:[#allocation4 + $0x1e8] sm:$0xff] }
  0x68   :  { %1634 = vpow2.f32 %v583_v21  ;;  %v1005_v54 = vmul.f32 %v924_v19, %v924_v19  ;;  %v915_v61 = vadd.f32 %v804_v16, %v403_v18  ;;  %v396_v23 = vmax.f32 %v2149_v7, 0.0 }
  0x69   :  { %v1625_v58 = vpop.eup %1624  ;;  %1636 = vpow2.f32 %v703_v10  ;;  %v998_v41 = vmul.f32 %v917_v32, %v917_v32  ;;  %v514_v24 = vand.u32 2147483647, %v2176_v48  ;;  %v389_v7 = vmax.f32 %v2152_v55, 0.0 }
  0x6a   :  { %v810_v0 = vmul.f32 0.6931472, %v1625_v58  ;;  %v1627_v3 = vpop.eup %1626  ;;  %1638 = vlog2.f32 %v715_v22  ;;  %1080 = vmatpush.xpose.msra.mxu1 %v1005_v54  ;;  %v996_v40 = vmul.f32 %v915_v61, %v915_v61  ;;  %v452_v21 = vand.u32 2147483647, %v2182_v26  ;;  %v2193_v54 = vld [vmem:[#allocation4 + $0x1a0] sm:$0xff] }
  0x6b   :  { %v1629_v12 = vpop.eup %1628  ;;  %v718_v36 = vadd.f32 1.0, %v1627_v3  ;;  %1101 = vmatpush.xpose.msra.mxu2 %v998_v41  ;;  %1640 = vpow2.f32 %v579_v47  ;;  %v578_v6 = vsub.f32 0.0, %v514_v24  ;;  %v512_v43 = vand.u32 2147483647, %v2184_v60 }
  0x6c   :  { %v918_v53 = vadd.f32 %v810_v0, %v406_v11  ;;  %v1631_v15 = vpop.eup %1630  ;;  %v806_v25 = vmul.f32 0.6931472, %v1629_v12  ;;  %1061 = vmatpush.xpose.msra.mxu0 %v996_v40  ;;  %v449_v5 = vmax.f32 %v2155_v17, 0.0  ;;  %v516_v58 = vsub.f32 0.0, %v452_v21  ;;  %v2207_v21 = vld [vmem:[#allocation4 + $0x160] sm:$0xff] }
  0x6d   :  { %v1633_v18 = vpop.eup %1632  ;;  %v792_v28 = vmul.f32 0.6931472, %v1631_v15  ;;  %1642 = vlog2.f32 %v718_v36  ;;  %v705_v57 = vmul.f32 1.442695, %v578_v6  ;;  %v576_v32 = vsub.f32 0.0, %v512_v43  ;;  %v2197_v15 = vld [vmem:[#allocation4 + $0x1b8] sm:$0xff] }
  0x6e   :  { %v999_v27 = vmul.f32 %v918_v53, %v918_v53  ;;  %v1635_v59 = vpop.eup %1634  ;;  %v916_v37 = vadd.f32 %v806_v25, %v404_v62  ;;  %v716_v34 = vadd.f32 1.0, %v1633_v18  ;;  %1644 = vpow2.f32 %v585_v8 }
  0x6f   :  { %v1637_v11 = vpop.eup %1636  ;;  %v909_v50 = vadd.f32 %v792_v28, %v397_v51  ;;  %v709_v33 = vadd.f32 1.0, %v1635_v59  ;;  %v699_v62 = vmul.f32 1.442695, %v575_v31  ;;  %v505_v45 = vand.u32 2147483647, %v2189_v44 }
  0x70   :  { %1121 = vmatpush.xpose.msra.mxu3 %v999_v27  ;;  %v1639_v35 = vpop.eup %1638  ;;  %v997_v52 = vmul.f32 %v916_v37, %v916_v37  ;;  %1646 = vlog2.f32 %v716_v34  ;;  %v769_v38 = vadd.f32 1.0, %v1637_v11  ;;  %v581_v3 = vmul.f32 1.442695, %v516_v58  ;;  %v2201_v11 = vld [vmem:[#allocation4 + $0x1a8] sm:$0xff] }
  0x71   :  { %v990_v39 = vmul.f32 %v909_v50, %v909_v50  ;;  %v788_v30 = vmul.f32 0.6931472, %v1639_v35  ;;  %1648 = vlog2.f32 %v709_v33  ;;  %v1641_v42 = vpop.eup %1640  ;;  %v701_v41 = vmul.f32 1.442695, %v576_v32 }
  0x72   :  { %1081 = vmatpush.xpose.msra.mxu1 %v997_v52  ;;  %1650 = vlog2.f32 %v769_v38  ;;  %v707_v10 = vadd.f32 1.0, %v1641_v42  ;;  %v387_v12 = vmax.f32 %v2161_v20, 0.0  ;;  %v569_v17 = vsub.f32 0.0, %v505_v45 }
  0x73   :  { %v1643_v29 = vpop.eup %1642  ;;  %1102 = vmatpush.xpose.msra.mxu2 %v990_v39  ;;  %v907_v51 = vadd.f32 %v788_v30, %v395_v2  ;;  %1652 = vpow2.f32 %v699_v62  ;;  %v503_v36 = vand.u32 2147483647, %v2193_v54  ;;  %v390_v28 = vmax.f32 %v2164_v14, 0.0 }
  0x74   :  { %v1645_v19 = vpop.eup %1644  ;;  %v794_v16 = vmul.f32 0.6931472, %v1643_v29  ;;  %1654 = vlog2.f32 %v707_v10  ;;  %v687_v18 = vmul.f32 1.442695, %v569_v17  ;;  %v506_v31 = vand.u32 2147483647, %v2197_v15 }
  0x75   :  { %v988_v55 = vmul.f32 %v907_v51, %v907_v51  ;;  %v710_v22 = vadd.f32 1.0, %v1645_v19  ;;  %1656 = vpow2.f32 %v705_v57  ;;  %v447_v14 = vmax.f32 %v2173_v1, 0.0 }
  0x76   :  { %v1647_v61 = vpop.eup %1646  ;;  %v910_v0 = vadd.f32 %v794_v16, %v398_v49  ;;  %v567_v49 = vsub.f32 0.0, %v503_v36  ;;  %v570_v62 = vsub.f32 0.0, %v506_v31  ;;  %v504_v42 = vand.u32 2147483647, %v2201_v11 }
  0x77   :  { %v1649_v47 = vpop.eup %1648  ;;  %1062 = vmatpush.xpose.msra.mxu0 %v988_v55  ;;  %v790_v4 = vmul.f32 0.6931472, %v1647_v61  ;;  %1658 = vlog2.f32 %v710_v22  ;;  %v450_v29 = vmax.f32 %v2176_v48, 0.0  ;;  %v388_v58 = vmax.f32 %v2182_v26, 0.0  ;;  %v2213_v22 = vld [vmem:[#allocation4 + $0x178] sm:$0xff] }
  0x78   :  { %v1651_v40 = vpop.eup %1650  ;;  %v991_v53 = vmul.f32 %v910_v0, %v910_v0  ;;  %v776_v2 = vmul.f32 0.6931472, %v1649_v47  ;;  %1660 = vpow2.f32 %v581_v3  ;;  %v683_v24 = vmul.f32 1.442695, %v567_v49 }
  0x79   :  { %v1653_v25 = vpop.eup %1652  ;;  %v908_v8 = vadd.f32 %v790_v4, %v396_v23  ;;  %v896_v13 = vmul.f32 0.6931472, %v1651_v40  ;;  %1662 = vpow2.f32 %v701_v41  ;;  %v689_v1 = vmul.f32 1.442695, %v570_v62  ;;  %v2221_v40 = vld [vmem:[#allocation4 + $0x130] sm:$0xff] }
  0x7a   :  { %1122 = vmatpush.xpose.msra.mxu3 %v991_v53  ;;  %v901_v27 = vadd.f32 %v776_v2, %v389_v7  ;;  %v767_v20 = vadd.f32 1.0, %v1653_v25  ;;  %v1655_v59 = vpop.eup %1654  ;;  %1664 = vpow2.f32 %v687_v18  ;;  %v2205_v7 = vld [vmem:[#allocation4 + $0x170] sm:$0xff]  ;;  %v568_v16 = vsub.f32 0.0, %v504_v42 }
  0x7b   :  { %v989_v37 = vmul.f32 %v908_v8, %v908_v8  ;;  %v961_v34 = vadd.f32 %v896_v13, %v449_v5  ;;  %v1657_v50 = vpop.eup %1656  ;;  %v772_v23 = vmul.f32 0.6931472, %v1655_v59  ;;  %v497_v32 = vand.u32 2147483647, %v2205_v7 }
  0x7c   :  { %v982_v33 = vmul.f32 %v901_v27, %v901_v27  ;;  %1666 = vlog2.f32 %v767_v20  ;;  %v770_v38 = vadd.f32 1.0, %v1657_v50  ;;  %v495_v55 = vand.u32 2147483647, %v2207_v21 }
  0x7d   :  { %v1659_v35 = vpop.eup %1658  ;;  %1082 = vmatpush.xpose.msra.mxu1 %v989_v37  ;;  %v1042_v52 = vmul.f32 %v961_v34, %v961_v34  ;;  %v899_v30 = vadd.f32 %v772_v23, %v387_v12  ;;  %1668 = vpow2.f32 %v683_v24  ;;  %v685_v0 = vmul.f32 1.442695, %v568_v16 }
  0x7e   :  { %v1661_v39 = vpop.eup %1660  ;;  %1103 = vmatpush.xpose.msra.mxu2 %v982_v33  ;;  %v778_v6 = vmul.f32 0.6931472, %v1659_v35  ;;  %1670 = vlog2.f32 %v770_v38  ;;  %v561_v41 = vsub.f32 0.0, %v497_v32  ;;  %v559_v47 = vsub.f32 0.0, %v495_v55 }
  0x7f   :  { %v1663_v43 = vpop.eup %1662  ;;  %v708_v51 = vadd.f32 1.0, %v1661_v39  ;;  %v980_v10 = vmul.f32 %v899_v30, %v899_v30  ;;  %v448_v4 = vmax.f32 %v2184_v60, 0.0  ;;  %v441_v12 = vmax.f32 %v2189_v44, 0.0 }
  0x80   :  { %v902_v57 = vadd.f32 %v778_v6, %v390_v28  ;;  %v768_v19 = vadd.f32 1.0, %v1663_v43  ;;  %v1665_v5 = vpop.eup %1664  ;;  %v498_v17 = vand.u32 2147483647, %v2213_v22  ;;  %v671_v25 = vmul.f32 1.442695, %v561_v41 }
  0x81   :  { %1672 = vlog2.f32 %v708_v51  ;;  %1104 = vmatmul.f32.vlgmr.msra.gmra.mxu2 %v2031_v46  ;;  %1063 = vmatpush.xpose.msra.mxu0 %v980_v10  ;;  %v761_v61 = vadd.f32 1.0, %v1665_v5  ;;  %v2219_v46 = vld [vmem:[#allocation4 + $0x168] sm:$0xff]  ;;  %v439_v13 = vmax.f32 %v2193_v54, 0.0  ;;  %v667_v60 = vmul.f32 1.442695, %v559_v47  ;;  %v2239_v47 = vld [vmem:[#allocation4 + $0xf0] sm:$0xff] }
  0x82   :  { %1176 = vmatpush.xpose.msrb.mxu2 %v1042_v52  ;;  %v1667_v48 = vpop.eup %1666  ;;  %v983_v45 = vmul.f32 %v902_v57, %v902_v57  ;;  %1674 = vlog2.f32 %v768_v19  ;;  %v562_v18 = vsub.f32 0.0, %v498_v17  ;;  %v496_v28 = vand.u32 2147483647, %v2219_v46  ;;  %v2228_v52 = vld [vmem:[#allocation4 + $0x120] sm:$0xff] }
  0x83   :  { %v892_v3 = vmul.f32 0.6931472, %v1667_v48  ;;  %1676 = vpow2.f32 %v689_v1  ;;  %v1669_v26 = vpop.eup %1668  ;;  %v489_v20 = vand.u32 2147483647, %v2221_v40  ;;  %v442_v42 = vmax.f32 %v2197_v15, 0.0 }
  0x84   :  { %1123 = vmatpush.xpose.msra.mxu3 %v983_v45  ;;  %1678 = vlog2.f32 %v761_v61  ;;  %v1671_v53 = vpop.eup %1670  ;;  %v759_v36 = vadd.f32 1.0, %v1669_v26  ;;  %1064 = vmatmul.f32.vlgmr.msra.gmra.mxu0 %v2035_v56  ;;  %v673_v34 = vmul.f32 1.442695, %v562_v18  ;;  %v560_v54 = vsub.f32 0.0, %v496_v28 }
  0x85   :  { %v959_v2 = vadd.f32 %v892_v3, %v447_v14  ;;  %1680 = vpow2.f32 %v685_v0  ;;  %v898_v8 = vmul.f32 0.6931472, %v1671_v53  ;;  %v553_v50 = vsub.f32 0.0, %v489_v20  ;;  %v2230_v14 = vld [vmem:[#allocation4 + $0x138] sm:$0xff] }
  0x86   :  { %1682 = vlog2.f32 %v759_v36  ;;  %v669_v39 = vmul.f32 1.442695, %v560_v54  ;;  %v487_v10 = vand.u32 2147483647, %v2228_v52  ;;  %v440_v16 = vmax.f32 %v2201_v11, 0.0 }
  0x87   :  { %v1673_v44 = vpop.eup %1672  ;;  %v1040_v27 = vmul.f32 %v959_v2, %v959_v2  ;;  %1124 = vmatmul.f32.vlgmr.msra.gmra.mxu3 %v2040_v63  ;;  %v962_v59 = vadd.f32 %v898_v8, %v450_v29  ;;  %1684 = vpow2.f32 %v671_v25  ;;  %v655_v30 = vmul.f32 1.442695, %v553_v50  ;;  %v2252_v50 = vld [vmem:[#allocation4 + $0xe8] sm:$0xff] }
  0x88   :  { %v1675_v49 = vpop.eup %1674  ;;  %v774_v37 = vmul.f32 0.6931472, %v1673_v44  ;;  %1686 = vpow2.f32 %v667_v60  ;;  %v490_v5 = vand.u32 2147483647, %v2230_v14  ;;  %v551_v48 = vsub.f32 0.0, %v487_v10 }
  0x89   :  { %v1677_v56 = vpop.eup %1676  ;;  %1136 = vmatpush.xpose.msrb.mxu0 %v1040_v27  ;;  %v894_v31 = vmul.f32 0.6931472, %v1675_v49  ;;  %v1043_v23 = vmul.f32 %v962_v59, %v962_v59  ;;  %1688 = vpow2.f32 %v673_v34  ;;  %v433_v0 = vmax.f32 %v2205_v7, 0.0  ;;  %v2249_v34 = vld [vmem:[#allocation4 + $0xf8] sm:$0xff] }
  0x8a   :  { %v1679_v33 = vpop.eup %1678  ;;  %v900_v24 = vadd.f32 %v774_v37, %v388_v58  ;;  %v762_v35 = vadd.f32 1.0, %v1677_v56  ;;  %v2236_v58 = vld [vmem:[#allocation4 + $0x128] sm:$0xff]  ;;  %v554_v41 = vsub.f32 0.0, %v490_v5  ;;  %v651_v26 = vmul.f32 1.442695, %v551_v48 }
  0x8b   :  { %v1681_v63 = vpop.eup %1680  ;;  %v960_v38 = vadd.f32 %v894_v31, %v448_v4  ;;  %v880_v62 = vmul.f32 0.6931472, %v1679_v33  ;;  %1196 = vmatpush.xpose.msrb.mxu3 %v1043_v23  ;;  %v488_v4 = vand.u32 2147483647, %v2236_v58  ;;  %v431_v2 = vmax.f32 %v2207_v21, 0.0 }
  0x8c   :  { %v981_v6 = vmul.f32 %v900_v24, %v900_v24  ;;  %1690 = vlog2.f32 %v762_v35  ;;  %v760_v43 = vadd.f32 1.0, %v1681_v63  ;;  %v1683_v29 = vpop.eup %1682  ;;  %v657_v7 = vmul.f32 1.442695, %v554_v41 }
  0x8d   :  { %v1041_v51 = vmul.f32 %v960_v38, %v960_v38  ;;  %v953_v1 = vadd.f32 %v880_v62, %v441_v12  ;;  %1692 = vpow2.f32 %v669_v39  ;;  %v1685_v57 = vpop.eup %1684  ;;  %v876_v19 = vmul.f32 0.6931472, %v1683_v29  ;;  %v2242_v12 = vld [vmem:[#allocation4 + $0xe0] sm:$0xff] }
  0x8e   :  { %1083 = vmatpush.xpose.msra.mxu1 %v981_v6  ;;  %1694 = vlog2.f32 %v760_v43  ;;  %v1687_v32 = vpop.eup %1686  ;;  %v753_v55 = vadd.f32 1.0, %v1685_v57  ;;  %v552_v8 = vsub.f32 0.0, %v488_v4  ;;  %v434_v18 = vmax.f32 %v2213_v22, 0.0 }
  0x8f   :  { %v1034_v15 = vmul.f32 %v953_v1, %v953_v1  ;;  %1696 = vpow2.f32 %v655_v30  ;;  %v1689_v45 = vpop.eup %1688  ;;  %v951_v61 = vadd.f32 %v876_v19, %v439_v13  ;;  %v751_v3 = vadd.f32 1.0, %v1687_v32 }
  0x90   :  { %1698 = vlog2.f32 %v753_v55  ;;  %v754_v11 = vadd.f32 1.0, %v1689_v45  ;;  %v481_v13 = vand.u32 2147483647, %v2239_v47  ;;  %v653_v21 = vmul.f32 1.442695, %v552_v8  ;;  %v2257_v45 = vld [vmem:[#allocation4 + $0xb0] sm:$0xff] }
  0x91   :  { %1177 = vmatpush.xpose.msrb.mxu2 %v1034_v15  ;;  %1084 = vmatmul.f32.vlgmr.msra.gmra.mxu1 %v2043_v9  ;;  %v1032_v53 = vmul.f32 %v951_v61, %v951_v61  ;;  %1700 = vlog2.f32 %v751_v3  ;;  %v479_v9 = vand.u32 2147483647, %v2242_v12  ;;  %v432_v22 = vmax.f32 %v2219_v46, 0.0  ;;  %v2259_v61 = vld [vmem:[#allocation4 + $0xa0] sm:$0xff] }
  0x92   :  { %1156 = vmatpush.xpose.msrb.mxu1 %v1041_v51  ;;  %v1691_v17 = vpop.eup %1690  ;;  %1702 = vlog2.f32 %v754_v11  ;;  %v545_v59 = vsub.f32 0.0, %v481_v13  ;;  %v425_v39 = vmax.f32 %v2221_v40, 0.0  ;;  %v482_v30 = vand.u32 2147483647, %v2249_v34 }
  0x93   :  { %v1693_v36 = vpop.eup %1692  ;;  %v882_v25 = vmul.f32 0.6931472, %v1691_v17  ;;  %1137 = vmatpush.xpose.msrb.mxu0 %v1032_v53  ;;  %1704 = vpow2.f32 %v651_v26  ;;  %v543_v37 = vsub.f32 0.0, %v479_v9  ;;  %v480_v46 = vand.u32 2147483647, %v2252_v50 }
  0x94   :  { %v1695_v60 = vpop.eup %1694  ;;  %v752_v44 = vadd.f32 1.0, %v1693_v36  ;;  %1706 = vpow2.f32 %v657_v7  ;;  %v639_v24 = vmul.f32 1.442695, %v545_v59  ;;  %v546_v10 = vsub.f32 0.0, %v482_v30  ;;  %v2272_v59 = vld [vmem:[#allocation4 + $0x70] sm:$0xff] }
  0x95   :  { %v1697_v27 = vpop.eup %1696  ;;  %v954_v28 = vadd.f32 %v882_v25, %v442_v42  ;;  %v878_v20 = vmul.f32 0.6931472, %v1695_v60  ;;  %v635_v35 = vmul.f32 1.442695, %v543_v37  ;;  %v544_v32 = vsub.f32 0.0, %v480_v46  ;;  %v2265_v25 = vld [vmem:[#allocation4 + $0xb8] sm:$0xff] }
  0x96   :  { %1708 = vlog2.f32 %v752_v44  ;;  %v745_v49 = vadd.f32 1.0, %v1697_v27  ;;  %v1699_v56 = vpop.eup %1698  ;;  %v641_v48 = vmul.f32 1.442695, %v546_v10  ;;  %v423_v17 = vmax.f32 %v2228_v52, 0.0 }
  0x97   :  { %v1035_v31 = vmul.f32 %v954_v28, %v954_v28  ;;  %v952_v54 = vadd.f32 %v878_v20, %v440_v16  ;;  %1710 = vpow2.f32 %v653_v21  ;;  %v1701_v33 = vpop.eup %1700  ;;  %v864_v23 = vmul.f32 0.6931472, %v1699_v56  ;;  %v2268_v28 = vld [vmem:[#allocation4 + $0xa8] sm:$0xff] }
  0x98   :  { %1712 = vlog2.f32 %v745_v49  ;;  %v1703_v63 = vpop.eup %1702  ;;  %v860_v62 = vmul.f32 0.6931472, %v1701_v33  ;;  %v637_v11 = vmul.f32 1.442695, %v544_v32  ;;  %v473_v7 = vand.u32 2147483647, %v2257_v45 }
  0x99   :  { %1197 = vmatpush.xpose.msrb.mxu3 %v1035_v31  ;;  %v1033_v38 = vmul.f32 %v952_v54, %v952_v54  ;;  %v1705_v6 = vpop.eup %1704  ;;  %v945_v42 = vadd.f32 %v864_v23, %v433_v0  ;;  %v866_v43 = vmul.f32 0.6931472, %v1703_v63  ;;  %1714 = vpow2.f32 %v639_v24 }
  0x9a   :  { %v1707_v29 = vpop.eup %1706  ;;  %v943_v51 = vadd.f32 %v860_v62, %v431_v2  ;;  %v743_v1 = vadd.f32 1.0, %v1705_v6  ;;  %1716 = vpow2.f32 %v635_v35  ;;  %v426_v2 = vmax.f32 %v2230_v14, 0.0 }
  0x9b   :  { %1157 = vmatpush.xpose.msrb.mxu1 %v1033_v38  ;;  %v1026_v19 = vmul.f32 %v945_v42, %v945_v42  ;;  %v946_v16 = vadd.f32 %v866_v43, %v434_v18  ;;  %v746_v5 = vadd.f32 1.0, %v1707_v29  ;;  %v471_v36 = vand.u32 2147483647, %v2259_v61  ;;  %v2277_v29 = vld [vmem:[#allocation4 + $0x60] sm:$0xff] }
  0x9c   :  { %v1709_v57 = vpop.eup %1708  ;;  %v1024_v15 = vmul.f32 %v943_v51, %v943_v51  ;;  %1718 = vlog2.f32 %v743_v1  ;;  %v424_v44 = vmax.f32 %v2236_v58, 0.0  ;;  %v537_v9 = vsub.f32 0.0, %v473_v7 }
  0x9d   :  { %v1711_v40 = vpop.eup %1710  ;;  %v862_v55 = vmul.f32 0.6931472, %v1709_v57  ;;  %1178 = vmatpush.xpose.msrb.mxu2 %v1026_v19  ;;  %v1027_v3 = vmul.f32 %v946_v16, %v946_v16  ;;  %1720 = vlog2.f32 %v746_v5  ;;  %v535_v27 = vsub.f32 0.0, %v471_v36  ;;  %v2279_v57 = vld [vmem:[#allocation4 + $0x78] sm:$0xff] }
  0x9e   :  { %v1713_v0 = vpop.eup %1712  ;;  %v744_v41 = vadd.f32 1.0, %v1711_v40  ;;  %1138 = vmatpush.xpose.msrb.mxu0 %v1024_v15  ;;  %1722 = vpow2.f32 %v641_v48  ;;  %v417_v21 = vmax.f32 %v2239_v47, 0.0  ;;  %v474_v49 = vand.u32 2147483647, %v2265_v25 }
  0x9f   :  { %v944_v26 = vadd.f32 %v862_v55, %v432_v22  ;;  %v848_v4 = vmul.f32 0.6931472, %v1713_v0  ;;  %v1715_v53 = vpop.eup %1714  ;;  %1198 = vmatpush.xpose.msrb.mxu3 %v1027_v3  ;;  %v623_v31 = vmul.f32 1.442695, %v537_v9  ;;  %v619_v58 = vmul.f32 1.442695, %v535_v27 }
  0xa0   :  { %1724 = vlog2.f32 %v744_v41  ;;  %v1717_v8 = vpop.eup %1716  ;;  %v737_v18 = vadd.f32 1.0, %v1715_v53  ;;  %v415_v33 = vmax.f32 %v2242_v12, 0.0  ;;  %v538_v23 = vsub.f32 0.0, %v474_v49  ;;  %v2284_v53 = vld [vmem:[#allocation4 + $0x68] sm:$0xff] }
  0xa1   :  { %v1025_v13 = vmul.f32 %v944_v26, %v944_v26  ;;  %v937_v60 = vadd.f32 %v848_v4, %v425_v39  ;;  %1726 = vpow2.f32 %v637_v11  ;;  %v735_v52 = vadd.f32 1.0, %v1717_v8 }
  0xa2   :  { %v1719_v14 = vpop.eup %1718  ;;  %1728 = vlog2.f32 %v737_v18  ;;  %v472_v24 = vand.u32 2147483647, %v2268_v28  ;;  %v465_v38 = vand.u32 2147483647, %v2272_v59  ;;  %v625_v6 = vmul.f32 1.442695, %v538_v23 }
  0xa3   :  { %1158 = vmatpush.xpose.msrb.mxu1 %v1025_v13  ;;  %v1018_v20 = vmul.f32 %v937_v60, %v937_v60  ;;  %v1721_v37 = vpop.eup %1720  ;;  %v844_v56 = vmul.f32 0.6931472, %v1719_v14  ;;  %1730 = vlog2.f32 %v735_v52  ;;  %v463_v55 = vand.u32 2147483647, %v2277_v29  ;;  %v2287_v52 = vld [vmem:[#allocation4 + $0x30] sm:$0xff] }
  0xa4   :  { %v1723_v54 = vpop.eup %1722  ;;  %v850_v22 = vmul.f32 0.6931472, %v1721_v37  ;;  %1732 = vpow2.f32 %v623_v31  ;;  %v536_v46 = vsub.f32 0.0, %v472_v24  ;;  %v529_v10 = vsub.f32 0.0, %v465_v38  ;;  %v2291_v37 = vld [vmem:[#allocation4 + $0x20] sm:$0xff] }
  0xa5   :  { %1179 = vmatpush.xpose.msrb.mxu2 %v1018_v20  ;;  %v935_v47 = vadd.f32 %v844_v56, %v423_v17  ;;  %v738_v63 = vadd.f32 1.0, %v1723_v54  ;;  %1734 = vpow2.f32 %v619_v58  ;;  %v418_v3 = vmax.f32 %v2249_v34, 0.0 }
  0xa6   :  { %v1725_v35 = vpop.eup %1724  ;;  %v938_v39 = vadd.f32 %v850_v22, %v426_v2  ;;  %v621_v5 = vmul.f32 1.442695, %v536_v46  ;;  %v607_v15 = vmul.f32 1.442695, %v529_v10  ;;  %v466_v41 = vand.u32 2147483647, %v2279_v57 }
  0xa7   :  { %v1727_v62 = vpop.eup %1726  ;;  %v846_v30 = vmul.f32 0.6931472, %v1725_v35  ;;  %v1016_v42 = vmul.f32 %v935_v47, %v935_v47  ;;  %1736 = vlog2.f32 %v738_v63  ;;  %v527_v17 = vsub.f32 0.0, %v463_v55  ;;  %v2295_v22 = vld [vmem:[#allocation4 + $0x38] sm:$0xff] }
  0xa8   :  { %v736_v43 = vadd.f32 1.0, %v1727_v62  ;;  %v1729_v12 = vpop.eup %1728  ;;  %v1019_v51 = vmul.f32 %v938_v39, %v938_v39  ;;  %1738 = vpow2.f32 %v625_v6  ;;  %v416_v36 = vmax.f32 %v2252_v50, 0.0 }
  0xa9   :  { %v936_v1 = vadd.f32 %v846_v30, %v424_v44  ;;  %v1731_v19 = vpop.eup %1730  ;;  %1139 = vmatpush.xpose.msrb.mxu0 %v1016_v42  ;;  %v832_v16 = vmul.f32 0.6931472, %v1729_v12  ;;  %v530_v13 = vsub.f32 0.0, %v466_v41  ;;  %v603_v44 = vmul.f32 1.442695, %v527_v17  ;;  %v2300_v12 = vld [vmem:[#allocation4 + $0x28] sm:$0xff] }
  0xaa   :  { %1740 = vlog2.f32 %v736_v43  ;;  %1199 = vmatpush.xpose.msrb.mxu3 %v1019_v51  ;;  %v828_v40 = vmul.f32 0.6931472, %v1731_v19  ;;  %v1733_v48 = vpop.eup %1732  ;;  %v464_v20 = vand.u32 2147483647, %v2284_v53  ;;  %v409_v50 = vmax.f32 %v2257_v45, 0.0 }
  0xab   :  { %v1017_v32 = vmul.f32 %v936_v1, %v936_v1  ;;  %v929_v0 = vadd.f32 %v832_v16, %v417_v21  ;;  %1742 = vpow2.f32 %v621_v5  ;;  %v1735_v11 = vpop.eup %1734  ;;  %v729_v4 = vadd.f32 1.0, %v1733_v48 }
  0xac   :  { %v927_v26 = vadd.f32 %v828_v40, %v415_v33  ;;  %1744 = vpow2.f32 %v607_v15  ;;  %v727_v8 = vadd.f32 1.0, %v1735_v11  ;;  %v609_v14 = vmul.f32 1.442695, %v530_v13 }
  0xad   :  { %1159 = vmatpush.xpose.msrb.mxu1 %v1017_v32  ;;  %v1737_v2 = vpop.eup %1736  ;;  %v1010_v7 = vmul.f32 %v929_v0, %v929_v0  ;;  %1746 = vlog2.f32 %v729_v4  ;;  %v407_v31 = vmax.f32 %v2259_v61, 0.0  ;;  %v528_v58 = vsub.f32 0.0, %v464_v20 }
  0xae   :  { %v1739_v60 = vpop.eup %1738  ;;  %v1008_v18 = vmul.f32 %v927_v26, %v927_v26  ;;  %v834_v34 = vmul.f32 0.6931472, %v1737_v2  ;;  %1748 = vlog2.f32 %v727_v8  ;;  %v457_v54 = vand.u32 2147483647, %v2287_v52 }
  0xaf   :  { %1180 = vmatpush.xpose.msrb.mxu2 %v1010_v7  ;;  %v730_v27 = vadd.f32 1.0, %v1739_v60  ;;  %1750 = vpow2.f32 %v603_v44  ;;  %v605_v63 = vmul.f32 1.442695, %v528_v58  ;;  %v455_v38 = vand.u32 2147483647, %v2291_v37 }
  0xb0   :  { %v1741_v9 = vpop.eup %1740  ;;  %1140 = vmatpush.xpose.msrb.mxu0 %v1008_v18  ;;  %v930_v21 = vadd.f32 %v834_v34, %v418_v3  ;;  %v521_v45 = vsub.f32 0.0, %v457_v54  ;;  %v410_v61 = vmax.f32 %v2265_v25, 0.0  ;;  %v458_v30 = vand.u32 2147483647, %v2295_v22 }
  0xb1   :  { %v830_v49 = vmul.f32 0.6931472, %v1741_v9  ;;  %v1743_v56 = vpop.eup %1742  ;;  %1752 = vlog2.f32 %v730_v27  ;;  %v519_v46 = vsub.f32 0.0, %v455_v38  ;;  %v408_v10 = vmax.f32 %v2268_v28, 0.0 }
  0xb2   :  { %v1745_v33 = vpop.eup %1744  ;;  %v1011_v23 = vmul.f32 %v930_v21, %v930_v21  ;;  %v728_v35 = vadd.f32 1.0, %v1743_v56  ;;  %1754 = vpow2.f32 %v609_v14  ;;  %v591_v43 = vmul.f32 1.442695, %v521_v45 }
  0xb3   :  { %v928_v24 = vadd.f32 %v830_v49, %v416_v36  ;;  %v721_v47 = vadd.f32 1.0, %v1745_v33  ;;  %v1747_v62 = vpop.eup %1746  ;;  %v522_v19 = vsub.f32 0.0, %v458_v30  ;;  %v587_v32 = vmul.f32 1.442695, %v519_v46 }
  0xb4   :  { %1200 = vmatpush.xpose.msrb.mxu3 %v1011_v23  ;;  %1756 = vlog2.f32 %v728_v35  ;;  %v1749_v6 = vpop.eup %1748  ;;  %v816_v42 = vmul.f32 0.6931472, %v1747_v62  ;;  %v456_v0 = vand.u32 2147483647, %v2300_v12  ;;  %v401_v41 = vmax.f32 %v2272_v59, 0.0 }
  0xb5   :  { %v1009_v39 = vmul.f32 %v928_v24, %v928_v24  ;;  %1758 = vlog2.f32 %v721_v47  ;;  %v1751_v51 = vpop.eup %1750  ;;  %v812_v1 = vmul.f32 0.6931472, %v1749_v6  ;;  %v593_v48 = vmul.f32 1.442695, %v522_v19  ;;  %v1826_v19 = vld [vmem:[%s2457_s18 + $0x30] sm:$0xff] }
  0xb6   :  { %1760 = vpow2.f32 %v605_v63  ;;  %v921_v5 = vadd.f32 %v816_v42, %v409_v50  ;;  %v719_v25 = vadd.f32 1.0, %v1751_v51  ;;  %v520_v17 = vsub.f32 0.0, %v456_v0 }
  0xb7   :  { %1160 = vmatpush.xpose.msrb.mxu1 %v1009_v39  ;;  %v1753_v16 = vpop.eup %1752  ;;  %1762 = vpow2.f32 %v591_v43  ;;  %v919_v15 = vadd.f32 %v812_v1, %v407_v31  ;;  %v399_v9 = vmax.f32 %v2277_v29, 0.0  ;;  %v402_v56 = vmax.f32 %v2279_v57, 0.0 }
  0xb8   :  { %v1755_v40 = vpop.eup %1754  ;;  %v818_v55 = vmul.f32 0.6931472, %v1753_v16  ;;  %v1002_v3 = vmul.f32 %v921_v5, %v921_v5  ;;  %1764 = vlog2.f32 %v719_v25  ;;  %v589_v60 = vmul.f32 1.442695, %v520_v17 }
  0xb9   :  { %v722_v11 = vadd.f32 1.0, %v1755_v40  ;;  %v1000_v28 = vmul.f32 %v919_v15, %v919_v15  ;;  %1766 = vpow2.f32 %v587_v32  ;;  %v400_v63 = vmax.f32 %v2284_v53, 0.0 }
  0xba   :  { %v1757_v26 = vpop.eup %1756  ;;  %v922_v4 = vadd.f32 %v818_v55, %v410_v61  ;;  %1181 = vmatpush.xpose.msrb.mxu2 %v1002_v3  ;;  %v393_v38 = vmax.f32 %v2287_v52, 0.0  ;;  %v391_v42 = vmax.f32 %v2291_v37, 0.0  ;;  %v394_v53 = vmax.f32 %v2295_v22, 0.0  ;;  %v1827_v22 = vld [vmem:[%s2457_s18 + $0x20] sm:$0xff] }
  0xbb   :  { %v1759_v2 = vpop.eup %1758  ;;  %v814_v7 = vmul.f32 0.6931472, %v1757_v26  ;;  %1768 = vlog2.f32 %v722_v11  ;;  %1141 = vmatpush.xpose.msrb.mxu0 %v1000_v28  ;;  %v978_v16 = vmul.f32 %v1826_v19, %v1826_v19  ;;  %v392_v32 = vmax.f32 %v2300_v12, 0.0  ;;  %v1829_v26 = vld [vmem:[%s2457_s18 + $0x28] sm:$0xff] }
  0xbc   :  { %v1761_v36 = vpop.eup %1760  ;;  %v1003_v8 = vmul.f32 %v922_v4, %v922_v4  ;;  %v800_v13 = vmul.f32 0.6931472, %v1759_v2  ;;  %1770 = vpow2.f32 %v593_v48  ;;  %v976_v48 = vmul.f32 %v1827_v22, %v1827_v22  ;;  %v222_v4 = vld [vmem:[%s2445_s7] sm:$0x1] }
  0xbd   :  { %v1763_v18 = vpop.eup %1762  ;;  %v920_v34 = vadd.f32 %v814_v7, %v408_v10  ;;  %v720_v59 = vadd.f32 1.0, %v1761_v36  ;;  %1772 = vpow2.f32 %v589_v60  ;;  %v977_v28 = vmul.f32 %v1829_v26, %v1829_v26 }
  0xbe   :  { %1201 = vmatpush.xpose.msrb.mxu3 %v1003_v8  ;;  %v913_v44 = vadd.f32 %v800_v13, %v401_v41  ;;  %v713_v27 = vadd.f32 1.0, %v1763_v18  ;;  %v1765_v14 = vpop.eup %1764  ;;  %v1828_v41 = vld [vmem:[%s2457_s18 + $0x38] sm:$0xff]  ;;  %v964_v17 = vand.u32 2147483647, %v222_v4  ;;  %v2327_v13 = vpop.f32.mrf.mxu0 }
  0xbf   :  { %v1001_v20 = vmul.f32 %v920_v34, %v920_v34  ;;  %1774 = vlog2.f32 %v720_v59  ;;  %v1767_v21 = vpop.eup %1766  ;;  %v796_v50 = vmul.f32 0.6931472, %v1765_v14  ;;  %v979_v11 = vmul.f32 %v1828_v41, %v1828_v41  ;;  %v1231_v18 = vld [vmem:[%s2447_s9 + $0x18] sm:$0xff]  ;;  %v2332_v59 = vpop.f32.mrf.mxu1  ;;  %v1230_v14 = vld [vmem:[%s2447_s9 + $0x10] sm:$0xff] }
  0xc0   :  { %v994_v49 = vmul.f32 %v913_v44, %v913_v44  ;;  %1776 = vlog2.f32 %v713_v27  ;;  %v711_v58 = vadd.f32 1.0, %v1767_v21  ;;  %v965_v2 = vsub.f32 0.0, %v964_v17 }
  0xc1   :  { %v1769_v31 = vpop.eup %1768  ;;  %1161 = vmatpush.xpose.msrb.mxu1 %v1001_v20  ;;  %v911_v33 = vadd.f32 %v796_v50, %v399_v9  ;;  %v1281_v34 = vand.u32 2147483647, %v1231_v18  ;;  %v963_v44 = vmax.f32 %v222_v4, 0.0  ;;  %v1280_v21 = vand.u32 2147483647, %v1230_v14 }
  0xc2   :  { %v1771_v54 = vpop.eup %1770  ;;  %1182 = vmatpush.xpose.msrb.mxu2 %v994_v49  ;;  %v802_v23 = vmul.f32 0.6931472, %v1769_v31  ;;  %1778 = vlog2.f32 %v711_v58  ;;  %v966_v7 = vmul.f32 1.442695, %v965_v2  ;;  %v2337_v49 = vpop.f32.mrf.mxu2  ;;  %v2344_v58 = vld [vmem:[%s2447_s9 + $0x8] sm:$0xff]  ;;  %v1277_v19 = vmax.f32 %v1231_v18, 0.0 }
  0xc3   :  { %v714_v29 = vadd.f32 1.0, %v1771_v54  ;;  %v1773_v24 = vpop.eup %1772  ;;  %v992_v35 = vmul.f32 %v911_v33, %v911_v33  ;;  %v1285_v27 = vsub.f32 0.0, %v1281_v34  ;;  %v1279_v33 = vand.u32 2147483647, %v2344_v58 }
  0xc4   :  { %v914_v47 = vadd.f32 %v802_v23, %v402_v56  ;;  %v712_v57 = vadd.f32 1.0, %v1773_v24  ;;  %v1284_v56 = vsub.f32 0.0, %v1280_v21  ;;  %v2347_v23 = vpop.f32.mrf.mxu3 }
  0xc5   :  { %v1775_v45 = vpop.eup %1774  ;;  %1780 = vlog2.f32 %v714_v29  ;;  %1142 = vmatpush.xpose.msrb.mxu0 %v992_v35  ;;  %v1292_v20 = vmul.f32 1.442695, %v1285_v27  ;;  %v1283_v24 = vsub.f32 0.0, %v1279_v33  ;;  %v1525_v27 = vld [vmem:[%s2444_s6] ss:$0 sm:$0xff] }
  0xc6   :  { %v1777_v62 = vpop.eup %1776  ;;  %v995_v39 = vmul.f32 %v914_v47, %v914_v47  ;;  %v798_v61 = vmul.f32 0.6931472, %v1775_v45  ;;  %1782 = vlog2.f32 %v712_v57  ;;  %v1290_v54 = vmul.f32 1.442695, %v1284_v56  ;;  %v2354_v47 = vld [vmem:[%s2447_s9] sm:$0xff] }
  0xc7   :  { %v784_v30 = vmul.f32 0.6931472, %v1777_v62  ;;  %1784 = vpow2.f32 %v966_v7  ;;  %v1288_v45 = vmul.f32 1.442695, %v1283_v24 }
  0xc8   :  { %1202 = vmatpush.xpose.msrb.mxu3 %v995_v39  ;;  %v912_v6 = vadd.f32 %v798_v61, %v400_v63  ;;  %v1779_v43 = vpop.eup %1778 }
  0xc9   :  { %v905_v46 = vadd.f32 %v784_v30, %v393_v38  ;;  %v780_v1 = vmul.f32 0.6931472, %v1779_v43  ;;  %v2339_v31 = vpop.f32.mrf.mxu0  ;;  %v1278_v38 = vand.u32 2147483647, %v2354_v47 }
  0xca   :  { %v993_v51 = vmul.f32 %v912_v6, %v912_v6 }
  0xcb   :  { %v1781_v10 = vpop.eup %1780  ;;  %v986_v52 = vmul.f32 %v905_v46, %v905_v46  ;;  %v903_v5 = vadd.f32 %v780_v1, %v391_v42  ;;  %v1282_v39 = vsub.f32 0.0, %v1278_v38 }
  0xcc   :  { %1162 = vmatpush.xpose.msrb.mxu1 %v993_v51  ;;  %v786_v25 = vmul.f32 0.6931472, %v1781_v10  ;;  %v1783_v40 = vpop.eup %1782  ;;  %v2349_v35 = vpop.f32.mrf.mxu1 }
  0xcd   :  { %1183 = vmatpush.xpose.msrb.mxu2 %v986_v52  ;;  %v984_v37 = vmul.f32 %v903_v5, %v903_v5  ;;  %v782_v55 = vmul.f32 0.6931472, %v1783_v40  ;;  %v1785_v36 = vpop.eup %1784  ;;  %v1286_v42 = vmul.f32 1.442695, %v1282_v39  ;;  %v1227_v52 = vld [vmem:[%s2446_s8 + $0x18] sm:$0xff]  ;;  %v1226_v40 = vld [vmem:[%s2446_s8 + $0x10] sm:$0xff] }
  0xce   :  { %v906_v15 = vadd.f32 %v786_v25, %v394_v53  ;;  %v968_v8 = vadd.f32 1.0, %v1785_v36  ;;  %v1224_v36 = vld [vmem:[%s2446_s8] sm:$0xff] }
  0xcf   :  { %1143 = vmatpush.xpose.msrb.mxu0 %v984_v37  ;;  %v904_v3 = vadd.f32 %v782_v55, %v392_v32  ;;  %v2357_v61 = vpop.f32.mrf.mxu2  ;;  %v1276_v55 = vmax.f32 %v1230_v14, 0.0 }
  0xd0   :  { %v987_v0 = vmul.f32 %v906_v15, %v906_v15  ;;  %1184 = vmatmul.f32.vlgmr.msrb.gmra.mxu2 %v978_v16  ;;  %1786 = vlog2.f32 %v968_v8  ;;  %v1274_v8 = vmax.f32 %v2354_v47, 0.0 }
  0xd1   :  { %v985_v12 = vmul.f32 %v904_v3, %v904_v3  ;;  %1788 = vpow2.f32 %v1292_v20 }
  0xd2   :  { %1203 = vmatpush.xpose.msrb.mxu3 %v987_v0  ;;  %1144 = vmatmul.f32.vlgmr.msrb.gmra.mxu0 %v976_v48  ;;  %1790 = vpow2.f32 %v1290_v54  ;;  %v2359_v51 = vpop.f32.mrf.mxu3  ;;  %v245_v54 = vadd.f32 %v1525_v27, %v2327_v13 }
  0xd3   :  { %1163 = vmatpush.xpose.msrb.mxu1 %v985_v12  ;;  %1792 = vpow2.f32 %v1288_v45  ;;  %1505 = vmatpush.xpose.msk.msra.mxu0 %vm1238_vm0, %v1227_v52  ;;  %v1225_v12 = vld [vmem:[%s2446_s8 + $0x8] sm:$0xff] }
  0xd4   :  { %v265_v47 = vadd.f32 %v2332_v59, %v245_v54  ;;  %v223_v59 = vld [vmem:[%s2439_s1] sm:$0xff] }
  0xd5   :  { %1204 = vmatmul.f32.vlgmr.msrb.gmra.mxu3 %v979_v11 }
  0xd6   :  { %1164 = vmatmul.f32.vlgmr.msrb.gmra.mxu1 %v977_v28  ;;  %v1787_v60 = vpop.eup %1786  ;;  %v1275_v28 = vmax.f32 %v2344_v58, 0.0  ;;  %v285_v45 = vadd.f32 %v2337_v49, %v265_v47 }
  0xd7   :  { %v970_v9 = vmul.f32 0.6931472, %v1787_v60  ;;  %v1789_v63 = vpop.eup %1788  ;;  %1506 = vmatpush.xpose.msk.msra.mxu0 %vm1238_vm0, %v1226_v40 }
  0xd8   :  { %v1297_v57 = vadd.f32 1.0, %v1789_v63  ;;  %v1791_v6 = vpop.eup %1790  ;;  %v305_v38 = vadd.f32 %v2347_v23, %v285_v45 }
  0xd9   :  { %v971_v50 = vadd.f32 %v970_v9, %v963_v44  ;;  %v1296_v43 = vadd.f32 1.0, %v1791_v6  ;;  %v1793_v53 = vpop.eup %1792 }
  0xda   :  { %1794 = vlog2.f32 %v1297_v57  ;;  %v1295_v25 = vadd.f32 1.0, %v1793_v53  ;;  %v325_v39 = vadd.f32 %v2339_v31, %v305_v38 }
  0xdb   :  { %v1044_v29 = vmul.f32 %v971_v50, %v971_v50  ;;  %1796 = vpow2.f32 %v1286_v42  ;;  %1507 = vmatpush.xpose.msk.msra.mxu0 %vm1238_vm0, %v1225_v12 }
  0xdc   :  { %1798 = vlog2.f32 %v1296_v43  ;;  %v345_v13 = vadd.f32 %v2349_v35, %v325_v39 }
  0xdd   :  { %v1046_v62 = vperm.slane %v1044_v29, 0  ;;  %1800 = vlog2.f32 %v1295_v25 }
  0xdf   :  { %1508 = vmatpush.xpose.msk.msra.mxu0 %vm1238_vm0, %v1224_v36 }
  0xe0   :  { %v1795_v10 = vpop.eup %1794 }
  0xe1   :  { %v1305_v5 = vmul.f32 0.6931472, %v1795_v10  ;;  %v1797_v37 = vpop.eup %1796 }
  0xe2   :  { %v1799_v22 = vpop.eup %1798  ;;  %v1294_v48 = vadd.f32 1.0, %v1797_v37 }
  0xe3   :  { %v1309_v15 = vadd.f32 %v1305_v5, %v1277_v19  ;;  %v1303_v41 = vmul.f32 0.6931472, %v1799_v22  ;;  %v1801_v4 = vpop.eup %1800 }
  0xe4   :  { %1802 = vlog2.f32 %v1294_v48  ;;  %v1301_v7 = vmul.f32 0.6931472, %v1801_v4 }
  0xe5   :  { %v1323_v3 = vmul.f32 %v1309_v15, %v1309_v15  ;;  %v1308_v26 = vadd.f32 %v1303_v41, %v1276_v55  ;;  %v1381_v15 = vld [vmem:[%s2451_s13] sm:$0xff] }
  0xe6   :  { %v1307_v34 = vadd.f32 %v1301_v7, %v1275_v28  ;;  %v1421_v22 = vand.u32 2147483647, %v1381_v15  ;;  %v1379_v28 = vld [vmem:[%s2450_s12] sm:$0xff] }
  0xe7   :  { %1510 = vmatpush.xpose.msk.msra.mxu1 %vm1238_vm0, %v1323_v3  ;;  %v1322_v2 = vmul.f32 %v1308_v26, %v1308_v26 }
  0xe8   :  { %v1321_v14 = vmul.f32 %v1307_v34, %v1307_v34 }
  0xea   :  { %v1803_v60 = vpop.eup %1802 }
  0xeb   :  { %1511 = vmatpush.xpose.msk.msra.mxu1 %vm1238_vm0, %v1322_v2  ;;  %v1299_v9 = vmul.f32 0.6931472, %v1803_v60 }
  0xed   :  { %v1306_v20 = vadd.f32 %v1299_v9, %v1274_v8 }
  0xef   :  { %1512 = vmatpush.xpose.msk.msra.mxu1 %vm1238_vm0, %v1321_v14  ;;  %v1320_v58 = vmul.f32 %v1306_v20, %v1306_v20 }
  0xf3   :  { %1513 = vmatpush.xpose.msk.msra.mxu1 %vm1238_vm0, %v1320_v58 }
 0x101   :  { %v1065_v30 = vpop.f32.mrf.mxu0 }
 0x102   :  { %v1066_v46 = vadd.f32 %v1065_v30, %v1046_v62 }
 0x104   :  { %v1105_v32 = vpop.f32.mrf.mxu2 }
 0x10a   :  { %v1125_v11 = vpop.f32.mrf.mxu3 }
 0x10e   :  { %v1085_v1 = vpop.f32.mrf.mxu1 }
 0x10f   :  { %v1086_v16 = vadd.f32 %v1085_v1, %v1066_v46  ;;  %v365_v46 = vadd.f32 %v2357_v61, %v345_v13  ;;  %v1233_v61 = vld [vmem:[%s2449_s11] sm:$0x1] }
 0x110   :  { %v1310_v2 = vmax.f32 %v1233_v61, 0.0 }
 0x111   :  { %v1106_v0 = vadd.f32 %v1105_v32, %v1086_v16  ;;  %v385_v31 = vadd.f32 %v2359_v51, %v365_v46  ;;  %v1311_v16 = vand.u32 2147483647, %v1233_v61  ;;  %v1382_v51 = vld [vmem:[%s2451_s13 + $0x8] sm:$0x3] }
 0x112   :  { %v1422_v32 = vand.u32 2147483647, %v1382_v51  ;;  %v1420_v36 = vmax.f32 %v1382_v51, 0.0 }
 0x113   :  { %v1126_v17 = vadd.f32 %v1125_v11, %v1106_v0  ;;  %v1312_v5 = vsub.f32 0.0, %v1311_v16  ;;  %v1423_v0 = vsub.f32 0.0, %v1421_v22  ;;  %v1380_v11 = vld [vmem:[%s2450_s12 + $0x8] sm:$0x3] }
 0x114   :  { %v1424_v37 = vsub.f32 0.0, %v1422_v32  ;;  %1515 = vmatpush.xpose.msk.msra.mxu2 %vm1389_vm3, %v1380_v11 }
 0x115   :  { %v1313_v25 = vmul.f32 1.442695, %v1312_v5  ;;  %v1425_v3 = vmul.f32 1.442695, %v1423_v0 }
 0x116   :  { %v1427_v55 = vmul.f32 1.442695, %v1424_v37 }
 0x118   :  { %1516 = vmatpush.xpose.msk.msra.mxu2 %vm1389_vm3, %v1379_v28 }
 0x14f   :  { %v1145_v18 = vpop.f32.mrf.mxu0 }
 0x150   :  { %v1146_v44 = vadd.f32 %v1145_v18, %v1126_v17 }
 0x153   :  { %v1165_v21 = vpop.f32.mrf.mxu1  ;;  %v1185_v50 = vpop.f32.mrf.mxu2 }
 0x154   :  { %v1166_v56 = vadd.f32 %v1165_v21, %v1146_v44  ;;  %v1419_v44 = vmax.f32 %v1381_v15, 0.0 }
 0x156   :  { %v1186_v33 = vadd.f32 %v1185_v50, %v1166_v56 }
 0x158   :  { %v1205_v29 = vpop.f32.mrf.mxu3 }
 0x159   :  { %v1206_v24 = vadd.f32 %v1205_v29, %v1186_v33 }
 0x15b   :  { %v1208_v63 = vadd.f32 1e-16, %v1206_v24 }
 0x15d   :  { %1804 = vrsqrt.f32 %v1208_v63  ;;  %vm1216_vm1 = vcmp.eq.f32.partialorder %v1208_v63, inf  ;;  %v1219_v49 = vand.u32 2147483648, %v1208_v63  ;;  %vm1218_vm2 = vcmp.eq.f32.partialorder %v1208_v63, 0.0 }
 0x15e   :  { %1806 = vpow2.f32 %v1313_v25 }
 0x15f   :  { %1808 = vpow2.f32 %v1427_v55 }
 0x163   :  { %v1805_v57 = vpop.eup %1804 }
 0x164   :  { %v1210_v62 = vmul.f32 %v1805_v57, %v1208_v63  ;;  %v1807_v40 = vpop.eup %1806 }
 0x165   :  { %v1315_v48 = vadd.f32 1.0, %v1807_v40  ;;  %v1809_v41 = vpop.eup %1808 }
 0x166   :  { %v1211_v30 = vmul.f32 %v1805_v57, %v1210_v62  ;;  %v1430_v12 = vadd.f32 1.0, %v1809_v41  ;;  %v1527_v41 = vld [vmem:[%s2452_s14] ss:$0 sm:$0xff] }
 0x167   :  { %1810 = vlog2.f32 %v1315_v48 }
 0x168   :  { %v1212_v6 = vmul.f32 0.5, %v1211_v30  ;;  %1812 = vpow2.f32 %v1425_v3  ;;  %v1234_v30 = vld [vmem:[%s2440_s2] sm:$0xff] }
 0x169   :  { %1814 = vlog2.f32 %v1430_v12 }
 0x16a   :  { %v1213_v42 = vsub.f32 1.5, %v1212_v6 }
 0x16c   :  { %v1214_v43 = vmul.f32 %v1805_v57, %v1213_v42  ;;  %v1526_v57 = vld [vmem:[%s2448_s10] ss:$0 sm:$0xff] }
 0x16d   :  { %v1811_v26 = vpop.eup %1810 }
 0x16e   :  { %v1215_v1 = vmul.f32 %v1214_v43, %v1208_v63  ;;  %v1813_v4 = vpop.eup %1812  ;;  %v1317_v7 = vmul.f32 0.6931472, %v1811_v26  ;;  %v1385_v26 = vld [vmem:[%s2441_s3] sm:$0xff] }
 0x16f   :  { %v1429_v17 = vadd.f32 1.0, %v1813_v4  ;;  %v1815_v8 = vpop.eup %1814 }
 0x170   :  { %v1217_v23 = vsel %vm1216_vm1, %v1208_v63, %v1215_v1  ;;  %v1318_v60 = vadd.f32 %v1317_v7, %v1310_v2  ;;  %v1434_v18 = vmul.f32 0.6931472, %v1815_v8 }
 0x171   :  { %v1220_v53 = vsel %vm1218_vm2, %v1219_v49, %v1217_v23  ;;  %1816 = vlog2.f32 %v1429_v17  ;;  %v1384_v23 = vld [vmem:[%s2453_s15] sm:$0x1] }
 0x172   :  { %v1221_v10 = vmul.f32 %v1220_v53, %v223_v59  ;;  %v1436_v34 = vadd.f32 %v1434_v18, %v1420_v36  ;;  %v1324_v27 = vmul.f32 %v1318_v60, %v1318_v60  ;;  %v1438_v53 = vand.u32 2147483647, %v1384_v23 }
 0x173   :  { %v1437_v61 = vmax.f32 %v1384_v23, 0.0 }
 0x174   :  { %v1222_v52 = vadd.f32 %v1221_v10, %v385_v31  ;;  %v1448_v14 = vmul.f32 %v1436_v34, %v1436_v34  ;;  %v1326_v50 = vperm.slane %v1324_v27, 0  ;;  %v1439_v31 = vsub.f32 0.0, %v1438_v53 }
 0x176   :  { %v1223_v19 = vmax.f32 %v1222_v52, 0.0  ;;  %1518 = vmatpush.xpose.msk.msra.mxu3 %vm1389_vm3, %v1448_v14  ;;  %v1440_v10 = vmul.f32 1.442695, %v1439_v31 }
 0x177   :  { %v1817_v9 = vpop.eup %1816 }
 0x178   :  { %1509 = vmatmul.msk.f32.vlgmr.msra.gmra.mxu0 %vm1238_vm0, %v1223_v19  ;;  %v1319_v35 = vmul.f32 %v1223_v19, %v1223_v19  ;;  %v1432_v20 = vmul.f32 0.6931472, %v1817_v9 }
 0x17a   :  { %1514 = vmatmul.msk.f32.vlgmr.msra.gmra.mxu1 %vm1238_vm0, %v1319_v35  ;;  %v1435_v21 = vadd.f32 %v1432_v20, %v1419_v44 }
 0x17c   :  { %v1447_v56 = vmul.f32 %v1435_v21, %v1435_v21 }
 0x17e   :  { %1519 = vmatpush.xpose.msk.msra.mxu3 %vm1389_vm3, %v1447_v56 }
 0x1f5   :  { %v1271_v39 = vpop.f32.mrf.mxu0 }
 0x1f6   :  { %v1272_v43 = vadd.f32 %v1526_v57, %v1271_v39 }
 0x1f7   :  { %v1360_v58 = vpop.f32.mrf.mxu1 }
 0x1f8   :  { %v1361_v54 = vadd.f32 %v1360_v58, %v1326_v50 }
 0x1fa   :  { %v1363_v33 = vadd.f32 1e-16, %v1361_v54 }
 0x1fc   :  { %1818 = vrsqrt.f32 %v1363_v33  ;;  %vm1371_vm4 = vcmp.eq.f32.partialorder %v1363_v33, inf  ;;  %v1374_v6 = vand.u32 2147483648, %v1363_v33  ;;  %vm1373_vm5 = vcmp.eq.f32.partialorder %v1363_v33, 0.0 }
 0x1fd   :  { %1820 = vpow2.f32 %v1440_v10 }
 0x202   :  { %v1819_v29 = vpop.eup %1818 }
 0x203   :  { %v1365_v24 = vmul.f32 %v1819_v29, %v1363_v33  ;;  %v1821_v52 = vpop.eup %1820 }
 0x204   :  { %v1442_v19 = vadd.f32 1.0, %v1821_v52 }
 0x205   :  { %v1366_v47 = vmul.f32 %v1819_v29, %v1365_v24 }
 0x206   :  { %1822 = vlog2.f32 %v1442_v19 }
 0x207   :  { %v1367_v63 = vmul.f32 0.5, %v1366_v47 }
 0x209   :  { %v1368_v45 = vsub.f32 1.5, %v1367_v63 }
 0x20b   :  { %v1369_v38 = vmul.f32 %v1819_v29, %v1368_v45 }
 0x20c   :  { %v1823_v35 = vpop.eup %1822 }
 0x20d   :  { %v1370_v62 = vmul.f32 %v1369_v38, %v1363_v33  ;;  %v1444_v16 = vmul.f32 0.6931472, %v1823_v35 }
 0x20f   :  { %v1372_v13 = vsel %vm1371_vm4, %v1363_v33, %v1370_v62  ;;  %v1445_v5 = vadd.f32 %v1444_v16, %v1437_v61 }
 0x210   :  { %v1375_v42 = vsel %vm1373_vm5, %v1374_v6, %v1372_v13 }
 0x211   :  { %v1376_v46 = vmul.f32 %v1375_v42, %v1234_v30  ;;  %v1449_v25 = vmul.f32 %v1445_v5, %v1445_v5 }
 0x213   :  { %v1377_v1 = vadd.f32 %v1376_v46, %v1272_v43  ;;  %v1451_v51 = vperm.slane %v1449_v25, 0 }
 0x215   :  { %v1378_v59 = vmax.f32 %v1377_v1, 0.0 }
 0x217   :  { %1517 = vmatmul.msk.f32.vlgmr.msra.gmra.mxu2 %vm1389_vm3, %v1378_v59  ;;  %v1446_v49 = vmul.f32 %v1378_v59, %v1378_v59 }
 0x219   :  { %1520 = vmatmul.msk.f32.vlgmr.msra.gmra.mxu3 %vm1389_vm3, %v1446_v49 }
 0x29a   :  { %v1416_v12 = vpop.f32.mrf.mxu2 }
 0x29b   :  { %v1417_v2 = vadd.f32 %v1527_v41, %v1416_v12 }
 0x29c   :  { %v1479_v32 = vpop.f32.mrf.mxu3 }
 0x29d   :  { %v1480_v40 = vadd.f32 %v1479_v32, %v1451_v51 }
 0x29f   :  { %v1482_v37 = vadd.f32 1e-16, %v1480_v40 }
 0x2a1   :  { %1824 = vrsqrt.f32 %v1482_v37  ;;  %vm1490_vm6 = vcmp.eq.f32.partialorder %v1482_v37, inf  ;;  %v1493_v28 = vand.u32 2147483648, %v1482_v37  ;;  %vm1492_vm7 = vcmp.eq.f32.partialorder %v1482_v37, 0.0 }
 0x2a7   :  { %v1825_v15 = vpop.eup %1824 }
 0x2a8   :  { %v1484_v55 = vmul.f32 %v1825_v15, %v1482_v37 }
 0x2aa   :  { %v1485_v22 = vmul.f32 %v1825_v15, %v1484_v55 }
 0x2ac   :  { %v1486_v48 = vmul.f32 0.5, %v1485_v22 }
 0x2ae   :  { %v1487_v0 = vsub.f32 1.5, %v1486_v48 }
 0x2b0   :  { %v1488_v3 = vmul.f32 %v1825_v15, %v1487_v0 }
 0x2b2   :  { %v1489_v11 = vmul.f32 %v1488_v3, %v1482_v37 }
 0x2b4   :  { %v1491_v4 = vsel %vm1490_vm6, %v1482_v37, %v1489_v11 }
 0x2b5   :  { %v1494_v17 = vsel %vm1492_vm7, %v1493_v28, %v1491_v4 }
 0x2b6   :  { %v1495_v7 = vmul.f32 %v1494_v17, %v1385_v26 }
 0x2b8   :  { %v1496_v36 = vadd.f32 %v1495_v7, %v1417_v2 }
 0x2ba   :  { %1498 = vst.msk [vmem:[%s2454_s16] sm:$0xff] %vm1497_vm8, %v1496_v36 }
 0x2bb   :  { %1503 = vsyncpa [#allocation3], 1 }
 0x2bc   :  { %1504 = vsyncpa [#allocation5], 1 }

</bundles_post_ra>
